<compile_context>
chip_gen: v7x
topology: tpu7x:2x2x1
jax: 0.10.0
libtpu: 0.0.40
codegen_flags: <defaults>
</compile_context>

<pallas_src>
import math
import jax
import jax.numpy as jnp
from jax.experimental import pallas as pl
from jax.experimental.pallas import tpu as pltpu

LANE = 128
SUBLANE = 8


def _round_up(v, m):
    return (v + m - 1) // m * m


def _pick_seq_chunk(S, Bt, Hp, budget_bytes=8 << 20):
    """Largest divisor of S (capped at 256) whose double-buffered chunk pair
    (bf16 x_proj in + f32 hs out) fits the VMEM chunk budget."""
    per_step = Bt * 4 * Hp * 2 + Bt * Hp * 4
    ts_cap = max(1, budget_bytes // (2 * per_step))
    ts = min(S, ts_cap, 256)
    while S % ts:
        ts -= 1
    return ts


def lstm_kernel(xp_ref, h0_ref, c0_ref, whh_ref, hs_ref, hn_ref, cn_ref,
                h_sc, c_sc):
    """One sequence chunk of the recurrence for one batch tile.

    xp:  (Ts, Bt, 4*Hp) bf16  precomputed x@W_ih^T + bias (gate-block layout)
    h0/c0: (Bt, Hp) f32       initial state (consumed only at s_idx == 0)
    whh: (Hp, 4*Hp) bf16      recurrent weights
    hs:  (Ts, Bt, Hp) f32     hidden sequence for this chunk
    hn/cn: (Bt, Hp) f32       final state (written only at the last chunk)
    h_sc/c_sc: (Bt, Hp) f32   VMEM carry across sequence chunks
    """
    s_idx = pl.program_id(1)
    n_seq = pl.num_programs(1)
    Ts = xp_ref.shape[0]
    Hp = h0_ref.shape[-1]

    @pl.when(s_idx == 0)
    def _():
        h_sc[...] = h0_ref[...]
        c_sc[...] = c0_ref[...]

    # TODO(synk): hold W_hh resident across the loop via pltpu.matmul_push_rhs /
    # matmul_acc_lhs / matmul_pop to drop the per-step weight re-stream from the
    # serial dependency chain (latency-bound regime at small B).
    def step(t, carry):
        h, c = carry
        # Recurrent gate matmul: bf16 operands, f32 accumulation on the MXU.
        gates = (jnp.dot(h.astype(whh_ref.dtype), whh_ref[...],
                         preferred_element_type=jnp.float32)
                 + xp_ref[t].astype(jnp.float32))          # (Bt, 4*Hp) f32

        # Lane-aligned gate views (each slice is a whole 128-lane block).
        i_g = jax.nn.sigmoid(gates[:, 0 * Hp:1 * Hp])
        f_g = jax.nn.sigmoid(gates[:, 1 * Hp:2 * Hp])
        g_g = jnp.tanh(gates[:, 2 * Hp:3 * Hp])
        o_g = jax.nn.sigmoid(gates[:, 3 * Hp:4 * Hp])

        c_new = f_g * c + i_g * g_g
        h_new = o_g * jnp.tanh(c_new)

        hs_ref[t] = h_new                                  # unmasked full-tile store
        return (h_new, c_new)

    h_fin, c_fin = jax.lax.fori_loop(0, Ts, step, (h_sc[...], c_sc[...]),
                                     unroll=min(Ts, 8))
    h_sc[...] = h_fin
    c_sc[...] = c_fin

    @pl.when(s_idx == n_seq - 1)
    def _():
        hn_ref[...] = h_fin
        cn_ref[...] = c_fin


def prepare_lstm_params(w_ih, w_hh, b_ih, b_hh, w_out, b_out):
    """One-time parameter preprocessing: padded gate-block layout + bf16 casts.

    Kept out of the per-call path (review item: remove wrapper weight padding
    from every forward).  Returns arrays only (jit-friendly pytree)."""
    f32 = jnp.float32
    w_ih = jnp.asarray(w_ih, f32)      # (4H, I)
    w_hh = jnp.asarray(w_hh, f32)      # (4H, H)
    b_ih = jnp.asarray(b_ih, f32)
    b_hh = jnp.asarray(b_hh, f32)
    w_out = jnp.asarray(w_out, f32)    # (1, H)
    b_out = jnp.asarray(b_out, f32)    # (1,)

    four_h, I = w_ih.shape
    H = four_h // 4
    Hp = _round_up(H, LANE)

    wih_t = w_ih.T                     # (I, 4H)
    whh_t = w_hh.T                     # (H, 4H)
    bias = b_ih + b_hh                 # (4H,)

    # Gate k occupies columns [k*Hp, k*Hp + H); padded columns/rows stay zero so
    # padded lanes of h/c remain exactly zero throughout the recurrence.
    wih_pad = jnp.zeros((I, 4 * Hp), f32)
    whh_pad = jnp.zeros((Hp, 4 * Hp), f32)
    bias_pad = jnp.zeros((4 * Hp,), f32)
    for k in range(4):
        wih_pad = wih_pad.at[:, k * Hp:k * Hp + H].set(wih_t[:, k * H:(k + 1) * H])
        whh_pad = whh_pad.at[:H, k * Hp:k * Hp + H].set(whh_t[:, k * H:(k + 1) * H])
        bias_pad = bias_pad.at[k * Hp:k * Hp + H].set(bias[k * H:(k + 1) * H])

    wout_pad = jnp.zeros((Hp, 1), f32).at[:H, 0].set(w_out.reshape(-1))

    return dict(
        wih_bf16=wih_pad.astype(jnp.bfloat16),   # (I, 4Hp)
        whh_bf16=whh_pad.astype(jnp.bfloat16),   # (Hp, 4Hp)
        bias=bias_pad,                           # (4Hp,)
        wout=wout_pad,                           # (Hp, 1)
        bout=b_out,                              # (1,)
    )


def lstm_forward(x, h0, c0, params):
    """x: (B, S, I); h0/c0: (1, B, H); params from prepare_lstm_params.

    Returns (y, (h_n, c_n)) with y: (B, S, 1), h_n/c_n: (1, B, H)."""
    f32 = jnp.float32
    x = x.astype(f32)
    B, S, I = x.shape
    H = h0.shape[-1]

    wih_bf16 = params["wih_bf16"]
    whh_bf16 = params["whh_bf16"]
    bias = params["bias"]
    wout = params["wout"]
    bout = params["bout"]
    Hp = whh_bf16.shape[0]

    # ---- batch padding to the f32 sublane multiple ----
    Bp = _round_up(B, SUBLANE)
    NB = 2 if Bp >= 16 else 1           # batch-tile axis for v7x's 2 TensorCores
    Bt = Bp // NB
    Ts = _pick_seq_chunk(S, Bt, Hp)
    NS = S // Ts

    x_pad = jnp.zeros((Bp, S, I), f32).at[:B].set(x)
    h0_pad = jnp.zeros((Bp, Hp), f32).at[:B, :H].set(h0[0].astype(f32))
    c0_pad = jnp.zeros((Bp, Hp), f32).at[:B, :H].set(c0[0].astype(f32))

    # ---- hoisted input projection: one big bf16 MXU matmul, stored as bf16 ----
    x_sm = jnp.transpose(x_pad, (1, 0, 2))                       # (S, Bp, I)
    x_proj = (jnp.dot(x_sm.reshape(S * Bp, I).astype(jnp.bfloat16), wih_bf16,
                      preferred_element_type=f32)
              + bias[None, :]).astype(jnp.bfloat16).reshape(S, Bp, 4 * Hp)

    # ---- explicit VMEM budget: weights + 2x chunk buffers + carries (+ headroom),
    #      capped at 48 MiB so the kernel stays inside v7x's 64 MiB physical VMEM.
    vmem_bytes = (Hp * 4 * Hp * 2                              # whh bf16
                  + 2 * Ts * Bt * (4 * Hp * 2 + Hp * 4)        # double-buffered chunks
                  + 8 * Bt * Hp * 4                            # h0/c0/hn/cn + carries
                  + (4 << 20))
    vmem_limit = int(min(max(vmem_bytes, 16 << 20), 48 << 20))

    grid_spec = pltpu.PrefetchScalarGridSpec(
        num_scalar_prefetch=0,
        grid=(NB, NS),
        in_specs=[
            pl.BlockSpec((Ts, Bt, 4 * Hp), lambda b, s: (s, b, 0)),   # x_proj chunk
            pl.BlockSpec((Bt, Hp), lambda b, s: (b, 0)),              # h0
            pl.BlockSpec((Bt, Hp), lambda b, s: (b, 0)),              # c0
            pl.BlockSpec((Hp, 4 * Hp), lambda b, s: (0, 0)),          # W_hh^T (bf16)
        ],
        out_specs=[
            pl.BlockSpec((Ts, Bt, Hp), lambda b, s: (s, b, 0)),       # hidden sequence
            pl.BlockSpec((Bt, Hp), lambda b, s: (b, 0)),              # h_n
            pl.BlockSpec((Bt, Hp), lambda b, s: (b, 0)),              # c_n
        ],
        scratch_shapes=[pltpu.VMEM((Bt, Hp), f32),                    # h carry
                        pltpu.VMEM((Bt, Hp), f32)],                   # c carry
    )

    hs_sm, hn_pad, cn_pad = pl.pallas_call(
        lstm_kernel,
        out_shape=(
            jax.ShapeDtypeStruct((S, Bp, Hp), f32),
            jax.ShapeDtypeStruct((Bp, Hp), f32),
            jax.ShapeDtypeStruct((Bp, Hp), f32),
        ),
        grid_spec=grid_spec,
        compiler_params=pltpu.CompilerParams(
            dimension_semantics=("parallel", "arbitrary"),
            vmem_limit_bytes=vmem_limit),
    )(x_proj, h0_pad, c0_pad, whh_bf16)

    # Output projection on the lane-dense seq-major slab (padded lanes of hs are
    # exactly zero and w_out is zero-padded), then transpose only the tiny result.
    y_sm = (jnp.dot(hs_sm.reshape(S * Bp, Hp), wout,
                    preferred_element_type=f32) + bout).reshape(S, Bp, 1)
    y = jnp.transpose(y_sm, (1, 0, 2))[:B]                       # (B, S, 1)

    h_n = hn_pad[:B, :H][None]
    c_n = cn_pad[:B, :H][None]
    return y, (h_n, c_n)


def _reference_forward(x, h0, c0, w_ih, w_hh, b_ih, b_hh, w_out, b_out,
                       *, bf16_matmul):
    """Pure-JAX reference (lax.scan) mirroring torch.nn.LSTM + Linear semantics.

    With bf16_matmul=True the matmul operands and the stored x_proj are rounded
    to bf16 (f32 accumulate/elementwise), mirroring the kernel's mixed precision."""
    f32 = jnp.float32
    H = h0.shape[-1]
    rnd = (lambda a: a.astype(jnp.bfloat16).astype(f32)) if bf16_matmul \
        else (lambda a: a.astype(f32))

    bias = (b_ih + b_hh).astype(f32)
    x_proj = jnp.einsum('bsi,gi->sbg', rnd(x.astype(f32)),
                        rnd(w_ih.astype(f32))) + bias              # (S, B, 4H)
    x_proj = rnd(x_proj)                                           # bf16 storage
    whh_r = rnd(w_hh.astype(f32))                                  # (4H, H)

    def step(carry, xp_t):
        h, c = carry
        gates = rnd(h) @ whh_r.T + xp_t
        i = jax.nn.sigmoid(gates[:, 0 * H:1 * H])
        f = jax.nn.sigmoid(gates[:, 1 * H:2 * H])
        g = jnp.tanh(gates[:, 2 * H:3 * H])
        o = jax.nn.sigmoid(gates[:, 3 * H:4 * H])
        c_new = f * c + i * g
        h_new = o * jnp.tanh(c_new)
        return (h_new, c_new), h_new

    (h_n, c_n), hs = jax.lax.scan(step, (h0[0].astype(f32), c0[0].astype(f32)),
                                  x_proj)
    y = hs @ w_out.astype(f32).T + b_out.astype(f32)               # (S, B, 1)
    return jnp.transpose(y, (1, 0, 2)), (h_n[None], c_n[None])


def _xavier_normal(key, shape):
    # matches torch xavier_normal_ fan computation for 3-D (1, B, H) tensors
    if len(shape) == 2:
        fan_in, fan_out = shape[1], shape[0]
    else:
        rf = 1
        for s in shape[2:]:
            rf *= s
        fan_in, fan_out = shape[1] * rf, shape[0] * rf
    std = math.sqrt(2.0 / float(fan_in + fan_out))
    return std * jax.random.normal(key, shape, dtype=jnp.float32)


if __name__ == "__main__":
    # small shapes consistent with the module's forward
    batch, seq, input_size, hidden_size = 2, 8, 16, 32

    key = jax.random.PRNGKey(0)
    keys = jax.random.split(key, 9)

    # deterministic synthetic parameters (PyTorch nn.LSTM uses U(-k, k), k=1/sqrt(H))
    k = 1.0 / math.sqrt(hidden_size)
    w_ih = jax.random.uniform(keys[0], (4 * hidden_size, input_size), jnp.float32, -k, k)
    w_hh = jax.random.uniform(keys[1], (4 * hidden_size, hidden_size), jnp.float32, -k, k)
    b_ih = jax.random.uniform(keys[2], (4 * hidden_size,), jnp.float32, -k, k)
    b_hh = jax.random.uniform(keys[3], (4 * hidden_size,), jnp.float32, -k, k)
    w_out = jax.random.uniform(keys[4], (1, hidden_size), jnp.float32, -k, k)
    b_out = jax.random.uniform(keys[5], (1,), jnp.float32, -k, k)

    # initial hidden state a la self.init_hidden() (xavier_normal on (1, B, H))
    h0 = _xavier_normal(keys[6], (1, batch, hidden_size))
    c0 = _xavier_normal(keys[7], (1, batch, hidden_size))

    x = jax.random.normal(keys[8], (batch, seq, input_size), dtype=jnp.float32)

    # one-time parameter prep (padding/bf16 casts out of the per-call path)
    params = prepare_lstm_params(w_ih, w_hh, b_ih, b_hh, w_out, b_out)
    fwd = jax.jit(lstm_forward)

    y, (h_n, c_n) = fwd(x, h0, c0, params)
    jax.block_until_ready((y, h_n, c_n))

    assert y.shape == (batch, seq, 1)
    assert h_n.shape == (1, batch, hidden_size) and c_n.shape == (1, batch, hidden_size)

    # Precision-matched reference (bf16 matmul operands + bf16 x_proj storage,
    # f32 accumulate/elementwise): validates the kernel logic tightly.
    y_ref, (h_ref, c_ref) = _reference_forward(
        x, h0, c0, w_ih, w_hh, b_ih, b_hh, w_out, b_out, bf16_matmul=True)
    assert jnp.allclose(y, y_ref, rtol=1e-3, atol=1e-3)
    assert jnp.allclose(h_n, h_ref, rtol=1e-3, atol=1e-3)
    assert jnp.allclose(c_n, c_ref, rtol=1e-3, atol=1e-3)

    # Full-f32 reference (faithful to the torch module); looser tolerance only
    # accounts for the bf16 rounding on the kernel path.
    y32, (h32, c32) = _reference_forward(
        x, h0, c0, w_ih, w_hh, b_ih, b_hh, w_out, b_out, bf16_matmul=False)
    assert jnp.allclose(y, y32, rtol=5e-2, atol=5e-2)
    assert jnp.allclose(h_n, h32, rtol=5e-2, atol=5e-2)
    assert jnp.allclose(c_n, c32, rtol=5e-2, atol=5e-2)

    print("KERNEL_OK")
</pallas_src>

<mosaic_0001>
module attributes {stable_mosaic.version = 11 : i64} {
  func.func @lstm_kernel(%arg0: i32, %arg1: i32, %arg2: memref<8x8x512xbf16, #tpu.memory_space<vmem>>, %arg3: memref<8x128xf32, #tpu.memory_space<vmem>>, %arg4: memref<8x128xf32, #tpu.memory_space<vmem>>, %arg5: memref<128x512xbf16, #tpu.memory_space<vmem>>, %arg6: memref<8x8x128xf32, #tpu.memory_space<vmem>>, %arg7: memref<8x128xf32, #tpu.memory_space<vmem>>, %arg8: memref<8x128xf32, #tpu.memory_space<vmem>>, %arg9: memref<8x128xf32, #tpu.memory_space<vmem>>, %arg10: memref<8x128xf32, #tpu.memory_space<vmem>>) attributes {dimension_semantics = [#tpu.dimension_semantics<parallel>, #tpu.dimension_semantics<arbitrary>], iteration_bounds = array<i64: 1, 1>, scalar_prefetch = 0 : i64, scratch_operands = 2 : i64, tpu.core_type = #tpu.core_type<tc>, window_params = [{transform_indices = @transform_0, window_bounds = array<i64: 8, 8, 512>}, {transform_indices = @transform_1, window_bounds = array<i64: 8, 128>}, {transform_indices = @transform_2, window_bounds = array<i64: 8, 128>}, {pipeline_mode = #tpu.pipeline_mode<synchronous>, transform_indices = @transform_3, window_bounds = array<i64: 128, 512>}, {transform_indices = @transform_4, window_bounds = array<i64: 8, 8, 128>}, {transform_indices = @transform_5, window_bounds = array<i64: 8, 128>}, {transform_indices = @transform_6, window_bounds = array<i64: 8, 128>}]} {
    %c0_i32 = arith.constant 0 : i32
    %0 = arith.cmpi eq, %arg1, %c0_i32 : i32
    %1 = arith.extui %0 : i1 to i32
    %c0_i32_0 = arith.constant 0 : i32
    %2 = arith.cmpi ne, %1, %c0_i32_0 : i32
    scf.if %2 {
      %c0_90 = arith.constant 0 : index
      %c0_91 = arith.constant 0 : index
      %306 = vector.load %arg3[%c0_90, %c0_91] : memref<8x128xf32, #tpu.memory_space<vmem>>, vector<8x128xf32>
      %c0_92 = arith.constant 0 : index
      %c0_93 = arith.constant 0 : index
      %307 = vector.load %arg9[%c0_92, %c0_93] : memref<8x128xf32, #tpu.memory_space<vmem>>, vector<8x128xf32>
      tpu.vector_store %arg9[%c0_92, %c0_93], %306 {strides = array<i32>} : memref<8x128xf32, #tpu.memory_space<vmem>>, vector<8x128xf32>,
      %c0_94 = arith.constant 0 : index
      %c0_95 = arith.constant 0 : index
      %308 = vector.load %arg4[%c0_94, %c0_95] : memref<8x128xf32, #tpu.memory_space<vmem>>, vector<8x128xf32>
      %c0_96 = arith.constant 0 : index
      %c0_97 = arith.constant 0 : index
      %309 = vector.load %arg10[%c0_96, %c0_97] : memref<8x128xf32, #tpu.memory_space<vmem>>, vector<8x128xf32>
      tpu.vector_store %arg10[%c0_96, %c0_97], %308 {strides = array<i32>} : memref<8x128xf32, #tpu.memory_space<vmem>>, vector<8x128xf32>,
    } else {
    }
    %c0 = arith.constant 0 : index
    %c0_1 = arith.constant 0 : index
    %3 = vector.load %arg9[%c0, %c0_1] : memref<8x128xf32, #tpu.memory_space<vmem>>, vector<8x128xf32>
    %c0_2 = arith.constant 0 : index
    %c0_3 = arith.constant 0 : index
    %4 = vector.load %arg10[%c0_2, %c0_3] : memref<8x128xf32, #tpu.memory_space<vmem>>, vector<8x128xf32>
    %c0_i32_4 = arith.constant 0 : i32
    %5 = arith.truncf %3 : vector<8x128xf32> to vector<8x128xbf16>
    %c0_5 = arith.constant 0 : index
    %c0_6 = arith.constant 0 : index
    %6 = vector.load %arg5[%c0_5, %c0_6] : memref<128x512xbf16, #tpu.memory_space<vmem>>, vector<128x512xbf16>
    %cst = arith.constant dense<0.000000e+00> : vector<8x512xf32>
    %7 = tpu.matmul %5, %6, %cst {dimension_numbers = #tpu.dot_dimension_numbers<[1], [0], [0], [1], [0, 0, 1, 1], [], []>} : vector<8x128xbf16>, vector<128x512xbf16>, vector<8x512xf32> -> vector<8x512xf32>
    %8 = arith.index_cast %c0_i32_4 : i32 to index
    %c0_7 = arith.constant 0 : index
    %c0_8 = arith.constant 0 : index
    %9 = vector.load %arg2[%8, %c0_7, %c0_8] : memref<8x8x512xbf16, #tpu.memory_space<vmem>>, vector<1x8x512xbf16>
    %10 = vector.shape_cast %9 : vector<1x8x512xbf16> to vector<8x512xbf16>
    %11 = arith.extf %10 : vector<8x512xbf16> to vector<8x512xf32>
    %12 = arith.addf %7, %11 : vector<8x512xf32>
    %13 = vector.extract_strided_slice %12 {offsets = [0, 0], sizes = [8, 128], strides = [1, 1]} : vector<8x512xf32> to vector<8x128xf32>
    %14 = arith.negf %13 : vector<8x128xf32>
    %15 = math.exp %14 : vector<8x128xf32>
    %cst_9 = arith.constant 1.000000e+00 : f32
    %16 = vector.broadcast %cst_9 : f32 to vector<8x128xf32>
    %17 = arith.addf %16, %15 : vector<8x128xf32>
    %18 = arith.divf %16, %17 : vector<8x128xf32>
    %19 = vector.extract_strided_slice %12 {offsets = [0, 128], sizes = [8, 128], strides = [1, 1]} : vector<8x512xf32> to vector<8x128xf32>
    %20 = arith.negf %19 : vector<8x128xf32>
    %21 = math.exp %20 : vector<8x128xf32>
    %cst_10 = arith.constant 1.000000e+00 : f32
    %22 = vector.broadcast %cst_10 : f32 to vector<8x128xf32>
    %23 = arith.addf %22, %21 : vector<8x128xf32>
    %24 = arith.divf %22, %23 : vector<8x128xf32>
    %25 = vector.extract_strided_slice %12 {offsets = [0, 256], sizes = [8, 128], strides = [1, 1]} : vector<8x512xf32> to vector<8x128xf32>
    %26 = math.tanh %25 : vector<8x128xf32>
    %27 = vector.extract_strided_slice %12 {offsets = [0, 384], sizes = [8, 128], strides = [1, 1]} : vector<8x512xf32> to vector<8x128xf32>
    %28 = arith.negf %27 : vector<8x128xf32>
    %29 = math.exp %28 : vector<8x128xf32>
    %cst_11 = arith.constant 1.000000e+00 : f32
    %30 = vector.broadcast %cst_11 : f32 to vector<8x128xf32>
    %31 = arith.addf %30, %29 : vector<8x128xf32>
    %32 = arith.divf %30, %31 : vector<8x128xf32>
    %33 = arith.mulf %24, %4 : vector<8x128xf32>
    %34 = arith.mulf %18, %26 : vector<8x128xf32>
    %35 = arith.addf %33, %34 : vector<8x128xf32>
    %36 = math.tanh %35 : vector<8x128xf32>
    %37 = arith.mulf %32, %36 : vector<8x128xf32>
    %38 = arith.index_cast %c0_i32_4 : i32 to index
    %c0_12 = arith.constant 0 : index
    %c0_13 = arith.constant 0 : index
    %39 = vector.load %arg6[%38, %c0_12, %c0_13] : memref<8x8x128xf32, #tpu.memory_space<vmem>>, vector<1x8x128xf32>
    %40 = vector.shape_cast %39 : vector<1x8x128xf32> to vector<8x128xf32>
    %41 = vector.shape_cast %37 : vector<8x128xf32> to vector<1x8x128xf32>
    tpu.vector_store %arg6[%38, %c0_12, %c0_13], %41 {strides = array<i32>} : memref<8x8x128xf32, #tpu.memory_space<vmem>>, vector<1x8x128xf32>,
    %c1_i32 = arith.constant 1 : i32
    %42 = arith.truncf %37 : vector<8x128xf32> to vector<8x128xbf16>
    %c0_14 = arith.constant 0 : index
    %c0_15 = arith.constant 0 : index
    %43 = vector.load %arg5[%c0_14, %c0_15] : memref<128x512xbf16, #tpu.memory_space<vmem>>, vector<128x512xbf16>
    %cst_16 = arith.constant dense<0.000000e+00> : vector<8x512xf32>
    %44 = tpu.matmul %42, %43, %cst_16 {dimension_numbers = #tpu.dot_dimension_numbers<[1], [0], [0], [1], [0, 0, 1, 1], [], []>} : vector<8x128xbf16>, vector<128x512xbf16>, vector<8x512xf32> -> vector<8x512xf32>
    %45 = arith.index_cast %c1_i32 : i32 to index
    %c0_17 = arith.constant 0 : index
    %c0_18 = arith.constant 0 : index
    %46 = vector.load %arg2[%45, %c0_17, %c0_18] : memref<8x8x512xbf16, #tpu.memory_space<vmem>>, vector<1x8x512xbf16>
    %47 = vector.shape_cast %46 : vector<1x8x512xbf16> to vector<8x512xbf16>
    %48 = arith.extf %47 : vector<8x512xbf16> to vector<8x512xf32>
    %49 = arith.addf %44, %48 : vector<8x512xf32>
    %50 = vector.extract_strided_slice %49 {offsets = [0, 0], sizes = [8, 128], strides = [1, 1]} : vector<8x512xf32> to vector<8x128xf32>
    %51 = arith.negf %50 : vector<8x128xf32>
    %52 = math.exp %51 : vector<8x128xf32>
    %cst_19 = arith.constant 1.000000e+00 : f32
    %53 = vector.broadcast %cst_19 : f32 to vector<8x128xf32>
    %54 = arith.addf %53, %52 : vector<8x128xf32>
    %55 = arith.divf %53, %54 : vector<8x128xf32>
    %56 = vector.extract_strided_slice %49 {offsets = [0, 128], sizes = [8, 128], strides = [1, 1]} : vector<8x512xf32> to vector<8x128xf32>
    %57 = arith.negf %56 : vector<8x128xf32>
    %58 = math.exp %57 : vector<8x128xf32>
    %cst_20 = arith.constant 1.000000e+00 : f32
    %59 = vector.broadcast %cst_20 : f32 to vector<8x128xf32>
    %60 = arith.addf %59, %58 : vector<8x128xf32>
    %61 = arith.divf %59, %60 : vector<8x128xf32>
    %62 = vector.extract_strided_slice %49 {offsets = [0, 256], sizes = [8, 128], strides = [1, 1]} : vector<8x512xf32> to vector<8x128xf32>
    %63 = math.tanh %62 : vector<8x128xf32>
    %64 = vector.extract_strided_slice %49 {offsets = [0, 384], sizes = [8, 128], strides = [1, 1]} : vector<8x512xf32> to vector<8x128xf32>
    %65 = arith.negf %64 : vector<8x128xf32>
    %66 = math.exp %65 : vector<8x128xf32>
    %cst_21 = arith.constant 1.000000e+00 : f32
    %67 = vector.broadcast %cst_21 : f32 to vector<8x128xf32>
    %68 = arith.addf %67, %66 : vector<8x128xf32>
    %69 = arith.divf %67, %68 : vector<8x128xf32>
    %70 = arith.mulf %61, %35 : vector<8x128xf32>
    %71 = arith.mulf %55, %63 : vector<8x128xf32>
    %72 = arith.addf %70, %71 : vector<8x128xf32>
    %73 = math.tanh %72 : vector<8x128xf32>
    %74 = arith.mulf %69, %73 : vector<8x128xf32>
    %75 = arith.index_cast %c1_i32 : i32 to index
    %c0_22 = arith.constant 0 : index
    %c0_23 = arith.constant 0 : index
    %76 = vector.load %arg6[%75, %c0_22, %c0_23] : memref<8x8x128xf32, #tpu.memory_space<vmem>>, vector<1x8x128xf32>
    %77 = vector.shape_cast %76 : vector<1x8x128xf32> to vector<8x128xf32>
    %78 = vector.shape_cast %74 : vector<8x128xf32> to vector<1x8x128xf32>
    tpu.vector_store %arg6[%75, %c0_22, %c0_23], %78 {strides = array<i32>} : memref<8x8x128xf32, #tpu.memory_space<vmem>>, vector<1x8x128xf32>,
    %c2_i32 = arith.constant 2 : i32
    %79 = arith.truncf %74 : vector<8x128xf32> to vector<8x128xbf16>
    %c0_24 = arith.constant 0 : index
    %c0_25 = arith.constant 0 : index
    %80 = vector.load %arg5[%c0_24, %c0_25] : memref<128x512xbf16, #tpu.memory_space<vmem>>, vector<128x512xbf16>
    %cst_26 = arith.constant dense<0.000000e+00> : vector<8x512xf32>
    %81 = tpu.matmul %79, %80, %cst_26 {dimension_numbers = #tpu.dot_dimension_numbers<[1], [0], [0], [1], [0, 0, 1, 1], [], []>} : vector<8x128xbf16>, vector<128x512xbf16>, vector<8x512xf32> -> vector<8x512xf32>
    %82 = arith.index_cast %c2_i32 : i32 to index
    %c0_27 = arith.constant 0 : index
    %c0_28 = arith.constant 0 : index
    %83 = vector.load %arg2[%82, %c0_27, %c0_28] : memref<8x8x512xbf16, #tpu.memory_space<vmem>>, vector<1x8x512xbf16>
    %84 = vector.shape_cast %83 : vector<1x8x512xbf16> to vector<8x512xbf16>
    %85 = arith.extf %84 : vector<8x512xbf16> to vector<8x512xf32>
    %86 = arith.addf %81, %85 : vector<8x512xf32>
    %87 = vector.extract_strided_slice %86 {offsets = [0, 0], sizes = [8, 128], strides = [1, 1]} : vector<8x512xf32> to vector<8x128xf32>
    %88 = arith.negf %87 : vector<8x128xf32>
    %89 = math.exp %88 : vector<8x128xf32>
    %cst_29 = arith.constant 1.000000e+00 : f32
    %90 = vector.broadcast %cst_29 : f32 to vector<8x128xf32>
    %91 = arith.addf %90, %89 : vector<8x128xf32>
    %92 = arith.divf %90, %91 : vector<8x128xf32>
    %93 = vector.extract_strided_slice %86 {offsets = [0, 128], sizes = [8, 128], strides = [1, 1]} : vector<8x512xf32> to vector<8x128xf32>
    %94 = arith.negf %93 : vector<8x128xf32>
    %95 = math.exp %94 : vector<8x128xf32>
    %cst_30 = arith.constant 1.000000e+00 : f32
    %96 = vector.broadcast %cst_30 : f32 to vector<8x128xf32>
    %97 = arith.addf %96, %95 : vector<8x128xf32>
    %98 = arith.divf %96, %97 : vector<8x128xf32>
    %99 = vector.extract_strided_slice %86 {offsets = [0, 256], sizes = [8, 128], strides = [1, 1]} : vector<8x512xf32> to vector<8x128xf32>
    %100 = math.tanh %99 : vector<8x128xf32>
    %101 = vector.extract_strided_slice %86 {offsets = [0, 384], sizes = [8, 128], strides = [1, 1]} : vector<8x512xf32> to vector<8x128xf32>
    %102 = arith.negf %101 : vector<8x128xf32>
    %103 = math.exp %102 : vector<8x128xf32>
    %cst_31 = arith.constant 1.000000e+00 : f32
    %104 = vector.broadcast %cst_31 : f32 to vector<8x128xf32>
    %105 = arith.addf %104, %103 : vector<8x128xf32>
    %106 = arith.divf %104, %105 : vector<8x128xf32>
    %107 = arith.mulf %98, %72 : vector<8x128xf32>
    %108 = arith.mulf %92, %100 : vector<8x128xf32>
    %109 = arith.addf %107, %108 : vector<8x128xf32>
    %110 = math.tanh %109 : vector<8x128xf32>
    %111 = arith.mulf %106, %110 : vector<8x128xf32>
    %112 = arith.index_cast %c2_i32 : i32 to index
    %c0_32 = arith.constant 0 : index
    %c0_33 = arith.constant 0 : index
    %113 = vector.load %arg6[%112, %c0_32, %c0_33] : memref<8x8x128xf32, #tpu.memory_space<vmem>>, vector<1x8x128xf32>
    %114 = vector.shape_cast %113 : vector<1x8x128xf32> to vector<8x128xf32>
    %115 = vector.shape_cast %111 : vector<8x128xf32> to vector<1x8x128xf32>
    tpu.vector_store %arg6[%112, %c0_32, %c0_33], %115 {strides = array<i32>} : memref<8x8x128xf32, #tpu.memory_space<vmem>>, vector<1x8x128xf32>,
    %c3_i32 = arith.constant 3 : i32
    %116 = arith.truncf %111 : vector<8x128xf32> to vector<8x128xbf16>
    %c0_34 = arith.constant 0 : index
    %c0_35 = arith.constant 0 : index
    %117 = vector.load %arg5[%c0_34, %c0_35] : memref<128x512xbf16, #tpu.memory_space<vmem>>, vector<128x512xbf16>
    %cst_36 = arith.constant dense<0.000000e+00> : vector<8x512xf32>
    %118 = tpu.matmul %116, %117, %cst_36 {dimension_numbers = #tpu.dot_dimension_numbers<[1], [0], [0], [1], [0, 0, 1, 1], [], []>} : vector<8x128xbf16>, vector<128x512xbf16>, vector<8x512xf32> -> vector<8x512xf32>
    %119 = arith.index_cast %c3_i32 : i32 to index
    %c0_37 = arith.constant 0 : index
    %c0_38 = arith.constant 0 : index
    %120 = vector.load %arg2[%119, %c0_37, %c0_38] : memref<8x8x512xbf16, #tpu.memory_space<vmem>>, vector<1x8x512xbf16>
    %121 = vector.shape_cast %120 : vector<1x8x512xbf16> to vector<8x512xbf16>
    %122 = arith.extf %121 : vector<8x512xbf16> to vector<8x512xf32>
    %123 = arith.addf %118, %122 : vector<8x512xf32>
    %124 = vector.extract_strided_slice %123 {offsets = [0, 0], sizes = [8, 128], strides = [1, 1]} : vector<8x512xf32> to vector<8x128xf32>
    %125 = arith.negf %124 : vector<8x128xf32>
    %126 = math.exp %125 : vector<8x128xf32>
    %cst_39 = arith.constant 1.000000e+00 : f32
    %127 = vector.broadcast %cst_39 : f32 to vector<8x128xf32>
    %128 = arith.addf %127, %126 : vector<8x128xf32>
    %129 = arith.divf %127, %128 : vector<8x128xf32>
    %130 = vector.extract_strided_slice %123 {offsets = [0, 128], sizes = [8, 128], strides = [1, 1]} : vector<8x512xf32> to vector<8x128xf32>
    %131 = arith.negf %130 : vector<8x128xf32>
    %132 = math.exp %131 : vector<8x128xf32>
    %cst_40 = arith.constant 1.000000e+00 : f32
    %133 = vector.broadcast %cst_40 : f32 to vector<8x128xf32>
    %134 = arith.addf %133, %132 : vector<8x128xf32>
    %135 = arith.divf %133, %134 : vector<8x128xf32>
    %136 = vector.extract_strided_slice %123 {offsets = [0, 256], sizes = [8, 128], strides = [1, 1]} : vector<8x512xf32> to vector<8x128xf32>
    %137 = math.tanh %136 : vector<8x128xf32>
    %138 = vector.extract_strided_slice %123 {offsets = [0, 384], sizes = [8, 128], strides = [1, 1]} : vector<8x512xf32> to vector<8x128xf32>
    %139 = arith.negf %138 : vector<8x128xf32>
    %140 = math.exp %139 : vector<8x128xf32>
    %cst_41 = arith.constant 1.000000e+00 : f32
    %141 = vector.broadcast %cst_41 : f32 to vector<8x128xf32>
    %142 = arith.addf %141, %140 : vector<8x128xf32>
    %143 = arith.divf %141, %142 : vector<8x128xf32>
    %144 = arith.mulf %135, %109 : vector<8x128xf32>
    %145 = arith.mulf %129, %137 : vector<8x128xf32>
    %146 = arith.addf %144, %145 : vector<8x128xf32>
    %147 = math.tanh %146 : vector<8x128xf32>
    %148 = arith.mulf %143, %147 : vector<8x128xf32>
    %149 = arith.index_cast %c3_i32 : i32 to index
    %c0_42 = arith.constant 0 : index
    %c0_43 = arith.constant 0 : index
    %150 = vector.load %arg6[%149, %c0_42, %c0_43] : memref<8x8x128xf32, #tpu.memory_space<vmem>>, vector<1x8x128xf32>
    %151 = vector.shape_cast %150 : vector<1x8x128xf32> to vector<8x128xf32>
    %152 = vector.shape_cast %148 : vector<8x128xf32> to vector<1x8x128xf32>
    tpu.vector_store %arg6[%149, %c0_42, %c0_43], %152 {strides = array<i32>} : memref<8x8x128xf32, #tpu.memory_space<vmem>>, vector<1x8x128xf32>,
    %c4_i32 = arith.constant 4 : i32
    %153 = arith.truncf %148 : vector<8x128xf32> to vector<8x128xbf16>
    %c0_44 = arith.constant 0 : index
    %c0_45 = arith.constant 0 : index
    %154 = vector.load %arg5[%c0_44, %c0_45] : memref<128x512xbf16, #tpu.memory_space<vmem>>, vector<128x512xbf16>
    %cst_46 = arith.constant dense<0.000000e+00> : vector<8x512xf32>
    %155 = tpu.matmul %153, %154, %cst_46 {dimension_numbers = #tpu.dot_dimension_numbers<[1], [0], [0], [1], [0, 0, 1, 1], [], []>} : vector<8x128xbf16>, vector<128x512xbf16>, vector<8x512xf32> -> vector<8x512xf32>
    %156 = arith.index_cast %c4_i32 : i32 to index
    %c0_47 = arith.constant 0 : index
    %c0_48 = arith.constant 0 : index
    %157 = vector.load %arg2[%156, %c0_47, %c0_48] : memref<8x8x512xbf16, #tpu.memory_space<vmem>>, vector<1x8x512xbf16>
    %158 = vector.shape_cast %157 : vector<1x8x512xbf16> to vector<8x512xbf16>
    %159 = arith.extf %158 : vector<8x512xbf16> to vector<8x512xf32>
    %160 = arith.addf %155, %159 : vector<8x512xf32>
    %161 = vector.extract_strided_slice %160 {offsets = [0, 0], sizes = [8, 128], strides = [1, 1]} : vector<8x512xf32> to vector<8x128xf32>
    %162 = arith.negf %161 : vector<8x128xf32>
    %163 = math.exp %162 : vector<8x128xf32>
    %cst_49 = arith.constant 1.000000e+00 : f32
    %164 = vector.broadcast %cst_49 : f32 to vector<8x128xf32>
    %165 = arith.addf %164, %163 : vector<8x128xf32>
    %166 = arith.divf %164, %165 : vector<8x128xf32>
    %167 = vector.extract_strided_slice %160 {offsets = [0, 128], sizes = [8, 128], strides = [1, 1]} : vector<8x512xf32> to vector<8x128xf32>
    %168 = arith.negf %167 : vector<8x128xf32>
    %169 = math.exp %168 : vector<8x128xf32>
    %cst_50 = arith.constant 1.000000e+00 : f32
    %170 = vector.broadcast %cst_50 : f32 to vector<8x128xf32>
    %171 = arith.addf %170, %169 : vector<8x128xf32>
    %172 = arith.divf %170, %171 : vector<8x128xf32>
    %173 = vector.extract_strided_slice %160 {offsets = [0, 256], sizes = [8, 128], strides = [1, 1]} : vector<8x512xf32> to vector<8x128xf32>
    %174 = math.tanh %173 : vector<8x128xf32>
    %175 = vector.extract_strided_slice %160 {offsets = [0, 384], sizes = [8, 128], strides = [1, 1]} : vector<8x512xf32> to vector<8x128xf32>
    %176 = arith.negf %175 : vector<8x128xf32>
    %177 = math.exp %176 : vector<8x128xf32>
    %cst_51 = arith.constant 1.000000e+00 : f32
    %178 = vector.broadcast %cst_51 : f32 to vector<8x128xf32>
    %179 = arith.addf %178, %177 : vector<8x128xf32>
    %180 = arith.divf %178, %179 : vector<8x128xf32>
    %181 = arith.mulf %172, %146 : vector<8x128xf32>
    %182 = arith.mulf %166, %174 : vector<8x128xf32>
    %183 = arith.addf %181, %182 : vector<8x128xf32>
    %184 = math.tanh %183 : vector<8x128xf32>
    %185 = arith.mulf %180, %184 : vector<8x128xf32>
    %186 = arith.index_cast %c4_i32 : i32 to index
    %c0_52 = arith.constant 0 : index
    %c0_53 = arith.constant 0 : index
    %187 = vector.load %arg6[%186, %c0_52, %c0_53] : memref<8x8x128xf32, #tpu.memory_space<vmem>>, vector<1x8x128xf32>
    %188 = vector.shape_cast %187 : vector<1x8x128xf32> to vector<8x128xf32>
    %189 = vector.shape_cast %185 : vector<8x128xf32> to vector<1x8x128xf32>
    tpu.vector_store %arg6[%186, %c0_52, %c0_53], %189 {strides = array<i32>} : memref<8x8x128xf32, #tpu.memory_space<vmem>>, vector<1x8x128xf32>,
    %c5_i32 = arith.constant 5 : i32
    %190 = arith.truncf %185 : vector<8x128xf32> to vector<8x128xbf16>
    %c0_54 = arith.constant 0 : index
    %c0_55 = arith.constant 0 : index
    %191 = vector.load %arg5[%c0_54, %c0_55] : memref<128x512xbf16, #tpu.memory_space<vmem>>, vector<128x512xbf16>
    %cst_56 = arith.constant dense<0.000000e+00> : vector<8x512xf32>
    %192 = tpu.matmul %190, %191, %cst_56 {dimension_numbers = #tpu.dot_dimension_numbers<[1], [0], [0], [1], [0, 0, 1, 1], [], []>} : vector<8x128xbf16>, vector<128x512xbf16>, vector<8x512xf32> -> vector<8x512xf32>
    %193 = arith.index_cast %c5_i32 : i32 to index
    %c0_57 = arith.constant 0 : index
    %c0_58 = arith.constant 0 : index
    %194 = vector.load %arg2[%193, %c0_57, %c0_58] : memref<8x8x512xbf16, #tpu.memory_space<vmem>>, vector<1x8x512xbf16>
    %195 = vector.shape_cast %194 : vector<1x8x512xbf16> to vector<8x512xbf16>
    %196 = arith.extf %195 : vector<8x512xbf16> to vector<8x512xf32>
    %197 = arith.addf %192, %196 : vector<8x512xf32>
    %198 = vector.extract_strided_slice %197 {offsets = [0, 0], sizes = [8, 128], strides = [1, 1]} : vector<8x512xf32> to vector<8x128xf32>
    %199 = arith.negf %198 : vector<8x128xf32>
    %200 = math.exp %199 : vector<8x128xf32>
    %cst_59 = arith.constant 1.000000e+00 : f32
    %201 = vector.broadcast %cst_59 : f32 to vector<8x128xf32>
    %202 = arith.addf %201, %200 : vector<8x128xf32>
    %203 = arith.divf %201, %202 : vector<8x128xf32>
    %204 = vector.extract_strided_slice %197 {offsets = [0, 128], sizes = [8, 128], strides = [1, 1]} : vector<8x512xf32> to vector<8x128xf32>
    %205 = arith.negf %204 : vector<8x128xf32>
    %206 = math.exp %205 : vector<8x128xf32>
    %cst_60 = arith.constant 1.000000e+00 : f32
    %207 = vector.broadcast %cst_60 : f32 to vector<8x128xf32>
    %208 = arith.addf %207, %206 : vector<8x128xf32>
    %209 = arith.divf %207, %208 : vector<8x128xf32>
    %210 = vector.extract_strided_slice %197 {offsets = [0, 256], sizes = [8, 128], strides = [1, 1]} : vector<8x512xf32> to vector<8x128xf32>
    %211 = math.tanh %210 : vector<8x128xf32>
    %212 = vector.extract_strided_slice %197 {offsets = [0, 384], sizes = [8, 128], strides = [1, 1]} : vector<8x512xf32> to vector<8x128xf32>
    %213 = arith.negf %212 : vector<8x128xf32>
    %214 = math.exp %213 : vector<8x128xf32>
    %cst_61 = arith.constant 1.000000e+00 : f32
    %215 = vector.broadcast %cst_61 : f32 to vector<8x128xf32>
    %216 = arith.addf %215, %214 : vector<8x128xf32>
    %217 = arith.divf %215, %216 : vector<8x128xf32>
    %218 = arith.mulf %209, %183 : vector<8x128xf32>
    %219 = arith.mulf %203, %211 : vector<8x128xf32>
    %220 = arith.addf %218, %219 : vector<8x128xf32>
    %221 = math.tanh %220 : vector<8x128xf32>
    %222 = arith.mulf %217, %221 : vector<8x128xf32>
    %223 = arith.index_cast %c5_i32 : i32 to index
    %c0_62 = arith.constant 0 : index
    %c0_63 = arith.constant 0 : index
    %224 = vector.load %arg6[%223, %c0_62, %c0_63] : memref<8x8x128xf32, #tpu.memory_space<vmem>>, vector<1x8x128xf32>
    %225 = vector.shape_cast %224 : vector<1x8x128xf32> to vector<8x128xf32>
    %226 = vector.shape_cast %222 : vector<8x128xf32> to vector<1x8x128xf32>
    tpu.vector_store %arg6[%223, %c0_62, %c0_63], %226 {strides = array<i32>} : memref<8x8x128xf32, #tpu.memory_space<vmem>>, vector<1x8x128xf32>,
    %c6_i32 = arith.constant 6 : i32
    %227 = arith.truncf %222 : vector<8x128xf32> to vector<8x128xbf16>
    %c0_64 = arith.constant 0 : index
    %c0_65 = arith.constant 0 : index
    %228 = vector.load %arg5[%c0_64, %c0_65] : memref<128x512xbf16, #tpu.memory_space<vmem>>, vector<128x512xbf16>
    %cst_66 = arith.constant dense<0.000000e+00> : vector<8x512xf32>
    %229 = tpu.matmul %227, %228, %cst_66 {dimension_numbers = #tpu.dot_dimension_numbers<[1], [0], [0], [1], [0, 0, 1, 1], [], []>} : vector<8x128xbf16>, vector<128x512xbf16>, vector<8x512xf32> -> vector<8x512xf32>
    %230 = arith.index_cast %c6_i32 : i32 to index
    %c0_67 = arith.constant 0 : index
    %c0_68 = arith.constant 0 : index
    %231 = vector.load %arg2[%230, %c0_67, %c0_68] : memref<8x8x512xbf16, #tpu.memory_space<vmem>>, vector<1x8x512xbf16>
    %232 = vector.shape_cast %231 : vector<1x8x512xbf16> to vector<8x512xbf16>
    %233 = arith.extf %232 : vector<8x512xbf16> to vector<8x512xf32>
    %234 = arith.addf %229, %233 : vector<8x512xf32>
    %235 = vector.extract_strided_slice %234 {offsets = [0, 0], sizes = [8, 128], strides = [1, 1]} : vector<8x512xf32> to vector<8x128xf32>
    %236 = arith.negf %235 : vector<8x128xf32>
    %237 = math.exp %236 : vector<8x128xf32>
    %cst_69 = arith.constant 1.000000e+00 : f32
    %238 = vector.broadcast %cst_69 : f32 to vector<8x128xf32>
    %239 = arith.addf %238, %237 : vector<8x128xf32>
    %240 = arith.divf %238, %239 : vector<8x128xf32>
    %241 = vector.extract_strided_slice %234 {offsets = [0, 128], sizes = [8, 128], strides = [1, 1]} : vector<8x512xf32> to vector<8x128xf32>
    %242 = arith.negf %241 : vector<8x128xf32>
    %243 = math.exp %242 : vector<8x128xf32>
    %cst_70 = arith.constant 1.000000e+00 : f32
    %244 = vector.broadcast %cst_70 : f32 to vector<8x128xf32>
    %245 = arith.addf %244, %243 : vector<8x128xf32>
    %246 = arith.divf %244, %245 : vector<8x128xf32>
    %247 = vector.extract_strided_slice %234 {offsets = [0, 256], sizes = [8, 128], strides = [1, 1]} : vector<8x512xf32> to vector<8x128xf32>
    %248 = math.tanh %247 : vector<8x128xf32>
    %249 = vector.extract_strided_slice %234 {offsets = [0, 384], sizes = [8, 128], strides = [1, 1]} : vector<8x512xf32> to vector<8x128xf32>
    %250 = arith.negf %249 : vector<8x128xf32>
    %251 = math.exp %250 : vector<8x128xf32>
    %cst_71 = arith.constant 1.000000e+00 : f32
    %252 = vector.broadcast %cst_71 : f32 to vector<8x128xf32>
    %253 = arith.addf %252, %251 : vector<8x128xf32>
    %254 = arith.divf %252, %253 : vector<8x128xf32>
    %255 = arith.mulf %246, %220 : vector<8x128xf32>
    %256 = arith.mulf %240, %248 : vector<8x128xf32>
    %257 = arith.addf %255, %256 : vector<8x128xf32>
    %258 = math.tanh %257 : vector<8x128xf32>
    %259 = arith.mulf %254, %258 : vector<8x128xf32>
    %260 = arith.index_cast %c6_i32 : i32 to index
    %c0_72 = arith.constant 0 : index
    %c0_73 = arith.constant 0 : index
    %261 = vector.load %arg6[%260, %c0_72, %c0_73] : memref<8x8x128xf32, #tpu.memory_space<vmem>>, vector<1x8x128xf32>
    %262 = vector.shape_cast %261 : vector<1x8x128xf32> to vector<8x128xf32>
    %263 = vector.shape_cast %259 : vector<8x128xf32> to vector<1x8x128xf32>
    tpu.vector_store %arg6[%260, %c0_72, %c0_73], %263 {strides = array<i32>} : memref<8x8x128xf32, #tpu.memory_space<vmem>>, vector<1x8x128xf32>,
    %c7_i32 = arith.constant 7 : i32
    %264 = arith.truncf %259 : vector<8x128xf32> to vector<8x128xbf16>
    %c0_74 = arith.constant 0 : index
    %c0_75 = arith.constant 0 : index
    %265 = vector.load %arg5[%c0_74, %c0_75] : memref<128x512xbf16, #tpu.memory_space<vmem>>, vector<128x512xbf16>
    %cst_76 = arith.constant dense<0.000000e+00> : vector<8x512xf32>
    %266 = tpu.matmul %264, %265, %cst_76 {dimension_numbers = #tpu.dot_dimension_numbers<[1], [0], [0], [1], [0, 0, 1, 1], [], []>} : vector<8x128xbf16>, vector<128x512xbf16>, vector<8x512xf32> -> vector<8x512xf32>
    %267 = arith.index_cast %c7_i32 : i32 to index
    %c0_77 = arith.constant 0 : index
    %c0_78 = arith.constant 0 : index
    %268 = vector.load %arg2[%267, %c0_77, %c0_78] : memref<8x8x512xbf16, #tpu.memory_space<vmem>>, vector<1x8x512xbf16>
    %269 = vector.shape_cast %268 : vector<1x8x512xbf16> to vector<8x512xbf16>
    %270 = arith.extf %269 : vector<8x512xbf16> to vector<8x512xf32>
    %271 = arith.addf %266, %270 : vector<8x512xf32>
    %272 = vector.extract_strided_slice %271 {offsets = [0, 0], sizes = [8, 128], strides = [1, 1]} : vector<8x512xf32> to vector<8x128xf32>
    %273 = arith.negf %272 : vector<8x128xf32>
    %274 = math.exp %273 : vector<8x128xf32>
    %cst_79 = arith.constant 1.000000e+00 : f32
    %275 = vector.broadcast %cst_79 : f32 to vector<8x128xf32>
    %276 = arith.addf %275, %274 : vector<8x128xf32>
    %277 = arith.divf %275, %276 : vector<8x128xf32>
    %278 = vector.extract_strided_slice %271 {offsets = [0, 128], sizes = [8, 128], strides = [1, 1]} : vector<8x512xf32> to vector<8x128xf32>
    %279 = arith.negf %278 : vector<8x128xf32>
    %280 = math.exp %279 : vector<8x128xf32>
    %cst_80 = arith.constant 1.000000e+00 : f32
    %281 = vector.broadcast %cst_80 : f32 to vector<8x128xf32>
    %282 = arith.addf %281, %280 : vector<8x128xf32>
    %283 = arith.divf %281, %282 : vector<8x128xf32>
    %284 = vector.extract_strided_slice %271 {offsets = [0, 256], sizes = [8, 128], strides = [1, 1]} : vector<8x512xf32> to vector<8x128xf32>
    %285 = math.tanh %284 : vector<8x128xf32>
    %286 = vector.extract_strided_slice %271 {offsets = [0, 384], sizes = [8, 128], strides = [1, 1]} : vector<8x512xf32> to vector<8x128xf32>
    %287 = arith.negf %286 : vector<8x128xf32>
    %288 = math.exp %287 : vector<8x128xf32>
    %cst_81 = arith.constant 1.000000e+00 : f32
    %289 = vector.broadcast %cst_81 : f32 to vector<8x128xf32>
    %290 = arith.addf %289, %288 : vector<8x128xf32>
    %291 = arith.divf %289, %290 : vector<8x128xf32>
    %292 = arith.mulf %283, %257 : vector<8x128xf32>
    %293 = arith.mulf %277, %285 : vector<8x128xf32>
    %294 = arith.addf %292, %293 : vector<8x128xf32>
    %295 = math.tanh %294 : vector<8x128xf32>
    %296 = arith.mulf %291, %295 : vector<8x128xf32>
    %297 = arith.index_cast %c7_i32 : i32 to index
    %c0_82 = arith.constant 0 : index
    %c0_83 = arith.constant 0 : index
    %298 = vector.load %arg6[%297, %c0_82, %c0_83] : memref<8x8x128xf32, #tpu.memory_space<vmem>>, vector<1x8x128xf32>
    %299 = vector.shape_cast %298 : vector<1x8x128xf32> to vector<8x128xf32>
    %300 = vector.shape_cast %296 : vector<8x128xf32> to vector<1x8x128xf32>
    tpu.vector_store %arg6[%297, %c0_82, %c0_83], %300 {strides = array<i32>} : memref<8x8x128xf32, #tpu.memory_space<vmem>>, vector<1x8x128xf32>,
    %c8_i32 = arith.constant 8 : i32
    %c0_84 = arith.constant 0 : index
    %c0_85 = arith.constant 0 : index
    %301 = vector.load %arg9[%c0_84, %c0_85] : memref<8x128xf32, #tpu.memory_space<vmem>>, vector<8x128xf32>
    tpu.vector_store %arg9[%c0_84, %c0_85], %296 {strides = array<i32>} : memref<8x128xf32, #tpu.memory_space<vmem>>, vector<8x128xf32>,
    %c0_86 = arith.constant 0 : index
    %c0_87 = arith.constant 0 : index
    %302 = vector.load %arg10[%c0_86, %c0_87] : memref<8x128xf32, #tpu.memory_space<vmem>>, vector<8x128xf32>
    tpu.vector_store %arg10[%c0_86, %c0_87], %294 {strides = array<i32>} : memref<8x128xf32, #tpu.memory_space<vmem>>, vector<8x128xf32>,
    %c0_i32_88 = arith.constant 0 : i32
    %303 = arith.cmpi eq, %arg1, %c0_i32_88 : i32
    %304 = arith.extui %303 : i1 to i32
    %c0_i32_89 = arith.constant 0 : i32
    %305 = arith.cmpi ne, %304, %c0_i32_89 : i32
    scf.if %305 {
      %c0_90 = arith.constant 0 : index
      %c0_91 = arith.constant 0 : index
      %306 = vector.load %arg7[%c0_90, %c0_91] : memref<8x128xf32, #tpu.memory_space<vmem>>, vector<8x128xf32>
      tpu.vector_store %arg7[%c0_90, %c0_91], %296 {strides = array<i32>} : memref<8x128xf32, #tpu.memory_space<vmem>>, vector<8x128xf32>,
      %c0_92 = arith.constant 0 : index
      %c0_93 = arith.constant 0 : index
      %307 = vector.load %arg8[%c0_92, %c0_93] : memref<8x128xf32, #tpu.memory_space<vmem>>, vector<8x128xf32>
      tpu.vector_store %arg8[%c0_92, %c0_93], %294 {strides = array<i32>} : memref<8x128xf32, #tpu.memory_space<vmem>>, vector<8x128xf32>,
    } else {
    }
    return
  }
  func.func @transform_0(%arg0: i32, %arg1: i32) -> (i32, i32, i32) {
    %c0_i32 = arith.constant 0 : i32
    %c0_i32_0 = arith.constant 0 : i32
    return %arg1, %arg0, %c0_i32 : i32, i32, i32
  }
  func.func @transform_1(%arg0: i32, %arg1: i32) -> (i32, i32) {
    %c0_i32 = arith.constant 0 : i32
    %c0_i32_0 = arith.constant 0 : i32
    return %arg0, %c0_i32 : i32, i32
  }
  func.func @transform_2(%arg0: i32, %arg1: i32) -> (i32, i32) {
    %c0_i32 = arith.constant 0 : i32
    %c0_i32_0 = arith.constant 0 : i32
    return %arg0, %c0_i32 : i32, i32
  }
  func.func @transform_3(%arg0: i32, %arg1: i32) -> (i32, i32) {
    %c0_i32 = arith.constant 0 : i32
    %c0_i32_0 = arith.constant 0 : i32
    %c0_i32_1 = arith.constant 0 : i32
    return %c0_i32, %c0_i32_0 : i32, i32
  }
  func.func @transform_4(%arg0: i32, %arg1: i32) -> (i32, i32, i32) {
    %c0_i32 = arith.constant 0 : i32
    %c0_i32_0 = arith.constant 0 : i32
    return %arg1, %arg0, %c0_i32 : i32, i32, i32
  }
  func.func @transform_5(%arg0: i32, %arg1: i32) -> (i32, i32) {
    %c0_i32 = arith.constant 0 : i32
    %c0_i32_0 = arith.constant 0 : i32
    return %arg0, %c0_i32 : i32, i32
  }
  func.func @transform_6(%arg0: i32, %arg1: i32) -> (i32, i32) {
    %c0_i32 = arith.constant 0 : i32
    %c0_i32_0 = arith.constant 0 : i32
    return %arg0, %c0_i32 : i32, i32
  }
}

</mosaic_0001>

<bundles_post_ra>
// kernel: lstm_forward.1
= control target key start
LH: loop header
LB: loop body
LE: loop exit
PB: predicated region body
PF: predicated region fallthrough
CT: control target
= control target key end

     0   :  { %v3038_v1 = vmov 0   ;;  %s3774_s3 = inlined_call_operand.vmem [shape: bf16[128,512], index: 3, kind: input, shape index: {}]   ;;  %s3775_s1 = inlined_call_operand.vmem [shape: f32[8,128], index: 1, kind: input, shape index: {}]   ;;  %s3776_s0 = inlined_call_operand.vmem [shape: bf16[8,8,512], index: 0, kind: input, shape index: {}]   ;;  %s3777_s2 = inlined_call_operand.vmem [shape: f32[8,128], index: 2, kind: input, shape index: {}]   ;;  %s3778_s4 = inlined_call_operand.vmem [shape: f32[8,8,128], index: 4, kind: output, shape index: {0}]   ;;  %s3779_s6 = inlined_call_operand.vmem [shape: f32[8,128], index: 6, kind: output, shape index: {2}]   ;;  %s3780_s5 = inlined_call_operand.vmem [shape: f32[8,128], index: 5, kind: output, shape index: {1}]  }
   0x1   :  { %v3077_v0 = vld [vmem:[%s3774_s3 + $0x4] ss:$16 sps:$4 sm:$0xff]   ;;  %262 = vmatprep.mubr.bf16.mxu0 %v3038_v1  ;;  %303 = vmatprep.mubr.bf16.mxu1 %v3038_v1  ;;  %v3084_v2 = vld [vmem:[%s3774_s3] ss:$16 sps:$4 sm:$0xff]   ;;  %v3107_v6 = vld [vmem:[%s3774_s3 + $0xc] ss:$16 sps:$4 sm:$0xff]  }
   0x2   :  { %230 = vmatprep.subr.bf16.mxu0 %v3077_v0  ;;  %v3090_v3 = vld [vmem:[%s3774_s3 + $0x24] ss:$16 sps:$4 sm:$0xff]   ;;  %v3096_v4 = vld [vmem:[%s3774_s3 + $0x20] ss:$16 sps:$4 sm:$0xff]   ;;  %v3112_v7 = vld [vmem:[%s3774_s3 + $0x8] ss:$16 sps:$4 sm:$0xff]   ;;  %271 = vmatprep.subr.bf16.mxu1 %v3107_v6 }
   0x3   :  { %231 = vmatpush1.bf16.msra.mxu0 %v3084_v2  ;;  %v3102_v5 = vld [vmem:[%s3774_s3 + $0x44] ss:$16 sps:$4 sm:$0xff]   ;;  %v3118_v8 = vld [vmem:[%s3774_s3 + $0x40] ss:$16 sps:$4 sm:$0xff]   ;;  %272 = vmatpush1.bf16.msra.mxu1 %v3112_v7  ;;  %v3131_v10 = vld [vmem:[%s3774_s3 + $0x2c] ss:$16 sps:$4 sm:$0xff]  }
   0x4   :  { %232 = vmatprep.subr.bf16.mxu0 %v3090_v3  ;;  %v3125_v9 = vld [vmem:[%s3774_s3 + $0x64] ss:$16 sps:$4 sm:$0xff]   ;;  %v3136_v11 = vld [vmem:[%s3774_s3 + $0x28] ss:$16 sps:$4 sm:$0xff]   ;;  %273 = vmatprep.subr.bf16.mxu1 %v3131_v10  ;;  %v3143_v12 = vld [vmem:[%s3774_s3 + $0x60] ss:$16 sps:$4 sm:$0xff]  }
   0x5   :  { %v3148_v13 = vld [vmem:[%s3774_s3 + $0x84] ss:$16 sps:$4 sm:$0xff]   ;;  %v3153_v14 = vld [vmem:[%s3774_s3 + $0x4c] ss:$16 sps:$4 sm:$0xff]   ;;  %v3160_v15 = vld [vmem:[%s3774_s3 + $0x48] ss:$16 sps:$4 sm:$0xff]  }
   0x6   :  { %v3166_v16 = vld [vmem:[%s3774_s3 + $0x6c] ss:$16 sps:$4 sm:$0xff]   ;;  %v3172_v17 = vld [vmem:[%s3774_s3 + $0x80] ss:$16 sps:$4 sm:$0xff]   ;;  %v3178_v18 = vld [vmem:[%s3774_s3 + $0xa4] ss:$16 sps:$4 sm:$0xff]  }
   0x7   :  { %233 = vmatpush1.bf16.msra.mxu0 %v3096_v4  ;;  %274 = vmatpush1.bf16.msra.mxu1 %v3136_v11  ;;  %v3184_v19 = vld [vmem:[%s3774_s3 + $0x68] ss:$16 sps:$4 sm:$0xff]   ;;  %v3190_v20 = vld [vmem:[%s3774_s3 + $0x8c] ss:$16 sps:$4 sm:$0xff]   ;;  %v3195_v21 = vld [vmem:[%s3774_s3 + $0xa0] ss:$16 sps:$4 sm:$0xff]  }
   0x8   :  { %234 = vmatprep.subr.bf16.mxu0 %v3102_v5  ;;  %275 = vmatprep.subr.bf16.mxu1 %v3153_v14  ;;  %v3201_v22 = vld [vmem:[%s3774_s3 + $0xc4] ss:$16 sps:$4 sm:$0xff]   ;;  %v3208_v23 = vld [vmem:[%s3774_s3 + $0x88] ss:$16 sps:$4 sm:$0xff]   ;;  %v3213_v24 = vld [vmem:[%s3774_s3 + $0xc0] ss:$16 sps:$4 sm:$0xff]  }
   0x9   :  { %v3219_v25 = vld [vmem:[%s3774_s3 + $0xac] ss:$16 sps:$4 sm:$0xff]   ;;  %v3224_v26 = vld [vmem:[%s3774_s3 + $0xe4] ss:$16 sps:$4 sm:$0xff]   ;;  %v3229_v27 = vld [vmem:[%s3774_s3 + $0xa8] ss:$16 sps:$4 sm:$0xff]  }
   0xa   :  { %v3235_v28 = vld [vmem:[%s3774_s3 + $0xcc] ss:$16 sps:$4 sm:$0xff]   ;;  %v3242_v29 = vld [vmem:[%s3774_s3 + $0xe0] ss:$16 sps:$4 sm:$0xff]   ;;  %v3251_v31 = vld [vmem:[%s3774_s3 + $0xc8] ss:$16 sps:$4 sm:$0xff]  }
   0xb   :  { %235 = vmatpush1.bf16.msra.mxu0 %v3118_v8  ;;  %276 = vmatpush1.bf16.msra.mxu1 %v3160_v15  ;;  %v25_v30 = vld [vmem:[%s3775_s1] sm:$0xff]  ;;  %v3257_v32 = vld [vmem:[%s3774_s3 + $0xec] ss:$16 sps:$4 sm:$0xff]   ;;  %v3267_v34 = vld [vmem:[%s3774_s3 + $0xe8] ss:$16 sps:$4 sm:$0xff]  }
   0xc   :  { %236 = vmatprep.subr.bf16.mxu0 %v3125_v9  ;;  %277 = vmatprep.subr.bf16.mxu1 %v3166_v16  ;;  %v31_v33 = vpack.c.bf16 %v25_v30, %v25_v30  ;;  %v64_v35 = vld [vmem:[%s3776_s0] sm:$0xff]  ;;  %v65_v39 = vld [vmem:[%s3776_s0 + $0x8] sm:$0xff] }
   0xd   :  { %v66_v36 = vunpack.c.l.bf16 %v64_v35  ;;  %v67_v37 = vunpack.c.h.bf16 %v64_v35  ;;  %v69_v46 = vunpack.c.h.bf16 %v65_v39  ;;  %v68_v52 = vunpack.c.l.bf16 %v65_v39  ;;  %v27_v62 = vld [vmem:[%s3777_s2] sm:$0xff] }
   0xf   :  { %237 = vmatpush1.bf16.msra.mxu0 %v3143_v12  ;;  %278 = vmatpush1.bf16.msra.mxu1 %v3184_v19 }
  0x10   :  { %238 = vmatprep.subr.bf16.mxu0 %v3148_v13  ;;  %279 = vmatprep.subr.bf16.mxu1 %v3190_v20 }
  0x13   :  { %239 = vmatpush1.bf16.msra.mxu0 %v3172_v17  ;;  %280 = vmatpush1.bf16.msra.mxu1 %v3208_v23 }
  0x14   :  { %240 = vmatprep.subr.bf16.mxu0 %v3178_v18  ;;  %281 = vmatprep.subr.bf16.mxu1 %v3219_v25 }
  0x17   :  { %241 = vmatpush1.bf16.msra.mxu0 %v3195_v21  ;;  %282 = vmatpush1.bf16.msra.mxu1 %v3229_v27 }
  0x18   :  { %242 = vmatprep.subr.bf16.mxu0 %v3201_v22  ;;  %283 = vmatprep.subr.bf16.mxu1 %v3235_v28 }
  0x1b   :  { %243 = vmatpush1.bf16.msra.mxu0 %v3213_v24  ;;  %284 = vmatpush1.bf16.msra.mxu1 %v3251_v31 }
  0x1c   :  { %244 = vmatprep.subr.bf16.mxu0 %v3224_v26  ;;  %285 = vmatprep.subr.bf16.mxu1 %v3257_v32 }
  0x1f   :  { %245 = vmatpush1.bf16.msra.mxu0 %v3242_v29  ;;  %286 = vmatpush1.bf16.msra.mxu1 %v3267_v34 }
  0x20   :  { %537 = vmatprep.subr.bf16.mxu0 %v3077_v0  ;;  %578 = vmatprep.subr.bf16.mxu1 %v3107_v6 }
  0x22   :  { %263 = vmatmul.mubr.bf16.vlgmr.msra.gmra.mrb[0].mxu0 %v31_v33  ;;  %304 = vmatmul.mubr.bf16.vlgmr.msra.gmra.mrb[0].mxu1 %v31_v33 }
  0x23   :  { %538 = vmatpush1.bf16.msra.mxu0 %v3084_v2  ;;  %569 = vmatprep.mubr.bf16.mxu0 %v3038_v1 }
  0x24   :  { %539 = vmatprep.subr.bf16.mxu0 %v3090_v3  ;;  %579 = vmatpush1.bf16.msra.mxu1 %v3112_v7 }
  0x25   :  { %580 = vmatprep.subr.bf16.mxu1 %v3131_v10  ;;  %610 = vmatprep.mubr.bf16.mxu1 %v3038_v1 }
  0x27   :  { %540 = vmatpush1.bf16.msra.mxu0 %v3096_v4 }
  0x28   :  { %541 = vmatprep.subr.bf16.mxu0 %v3102_v5  ;;  %581 = vmatpush1.bf16.msra.mxu1 %v3136_v11 }
  0x29   :  { %582 = vmatprep.subr.bf16.mxu1 %v3153_v14 }
  0x2b   :  { %542 = vmatpush1.bf16.msra.mxu0 %v3118_v8 }
  0x2c   :  { %543 = vmatprep.subr.bf16.mxu0 %v3125_v9  ;;  %583 = vmatpush1.bf16.msra.mxu1 %v3160_v15 }
  0x2d   :  { %584 = vmatprep.subr.bf16.mxu1 %v3166_v16 }
  0x2f   :  { %544 = vmatpush1.bf16.msra.mxu0 %v3143_v12 }
  0x30   :  { %545 = vmatprep.subr.bf16.mxu0 %v3148_v13  ;;  %585 = vmatpush1.bf16.msra.mxu1 %v3184_v19 }
  0x31   :  { %586 = vmatprep.subr.bf16.mxu1 %v3190_v20 }
  0x33   :  { %546 = vmatpush1.bf16.msra.mxu0 %v3172_v17 }
  0x34   :  { %547 = vmatprep.subr.bf16.mxu0 %v3178_v18  ;;  %587 = vmatpush1.bf16.msra.mxu1 %v3208_v23 }
  0x35   :  { %588 = vmatprep.subr.bf16.mxu1 %v3219_v25 }
  0x37   :  { %548 = vmatpush1.bf16.msra.mxu0 %v3195_v21 }
  0x38   :  { %549 = vmatprep.subr.bf16.mxu0 %v3201_v22  ;;  %589 = vmatpush1.bf16.msra.mxu1 %v3229_v27 }
  0x39   :  { %590 = vmatprep.subr.bf16.mxu1 %v3235_v28 }
  0x3b   :  { %550 = vmatpush1.bf16.msra.mxu0 %v3213_v24 }
  0x3c   :  { %551 = vmatprep.subr.bf16.mxu0 %v3224_v26  ;;  %591 = vmatpush1.bf16.msra.mxu1 %v3251_v31 }
  0x3d   :  { %592 = vmatprep.subr.bf16.mxu1 %v3257_v32 }
  0x3f   :  { %552 = vmatpush1.bf16.msra.mxu0 %v3242_v29 }
  0x40   :  { %845 = vmatprep.subr.bf16.mxu0 %v3077_v0  ;;  %593 = vmatpush1.bf16.msra.mxu1 %v3267_v34 }
  0x41   :  { %886 = vmatprep.subr.bf16.mxu1 %v3107_v6 }
  0xf5   :  { %v264_v38 = vpop.f32.mrb[0].mxu0  ;;  %v305_v48 = vpop.f32.mrb[0].mxu1 }
  0xf6   :  { %v265_v40 = vadd.f32 %v264_v38, %v66_v36  ;;  %v266_v41 = vpop.f32.mrb[1].mxu0  ;;  %v307_v49 = vpop.f32.mrb[1].mxu1  ;;  %v306_v55 = vadd.f32 %v305_v48, %v68_v52  ;;  %v2548_v48 = vld [vmem:[%s3776_s0 + $0x18] sm:$0xff] }
  0xf7   :  { %v267_v42 = vadd.f32 %v266_v41, %v67_v37  ;;  %v268_v43 = vpop.f32.mrb[2].mxu0  ;;  %v308_v50 = vadd.f32 %v307_v49, %v69_v46  ;;  %v309_v51 = vpop.f32.mrb[2].mxu1 }
  0xf8   :  { %v2544_v44 = vmul.f32 -1.442695, %v265_v40  ;;  %v269_v45 = vpop.f32.mrb[3].mxu0  ;;  %v310_v53 = vpop.f32.mrb[3].mxu1 }
  0xf9   :  { %v2545_v47 = vmul.f32 -1.442695, %v267_v42  ;;  %v2546_v54 = vmul.f32 -1.442695, %v308_v50  ;;  %v2547_v42 = vld [vmem:[%s3776_s0 + $0x10] sm:$0xff] }
  0xfa   :  { %2910 = vpow2.f32 %v2544_v44  ;;  %v373_v43 = vunpack.c.l.bf16 %v2547_v42  ;;  %v374_v44 = vunpack.c.h.bf16 %v2547_v42 }
  0xfb   :  { %2912 = vpow2.f32 %v2545_v47 }
  0xfc   :  { %2914 = vpow2.f32 %v2546_v54 }
  0xfd   :  { %2916 = vtanh.f32 %v306_v55 }
 0x104   :  { %v2911_v56 = vpop.eup %2910 }
 0x105   :  { %v2913_v57 = vpop.eup %2912  ;;  %v315_v58 = vadd.f32 1.0, %v2911_v56  ;;  %v376_v56 = vunpack.c.h.bf16 %v2548_v48 }
 0x106   :  { %v321_v59 = vadd.f32 1.0, %v2913_v57  ;;  %v2915_v60 = vpop.eup %2914 }
 0x107   :  { %2918 = vrcp.f32 %v315_v58  ;;  %v2917_v61 = vpop.eup %2916  ;;  %v328_v30 = vadd.f32 1.0, %v2915_v60  ;;  %v375_v58 = vunpack.c.l.bf16 %v2548_v48 }
 0x108   :  { %2920 = vrcp.f32 %v321_v59 }
 0x109   :  { %2922 = vrcp.f32 %v328_v30 }
 0x111   :  { %v2919_v63 = vpop.eup %2918 }
 0x112   :  { %v2921_v33 = vpop.eup %2920  ;;  %v332_v35 = vmul.f32 %v2919_v63, %v2917_v61 }
 0x113   :  { %v331_v36 = vmul.f32 %v2921_v33, %v27_v62  ;;  %v2923_v38 = vpop.eup %2922 }
 0x115   :  { %v3316_v37 = vadd.f32 %v332_v35, %v331_v36 }
 0x117   :  { %2924 = vtanh.f32 %v3316_v37 }
 0x121   :  { %v2925_v39 = vpop.eup %2924 }
 0x122   :  { %v335_v40 = vmul.f32 %v2925_v39, %v2923_v38 }
 0x124   :  { %336 = vst [vmem:[%s3778_s4] sm:$0xff] %v335_v40  ;;  %v337_v41 = vpack.c.bf16 %v335_v40, %v335_v40 }
 0x126   :  { %570 = vmatmul.mubr.bf16.vlgmr.msra.gmra.mrb[4].mxu0 %v337_v41  ;;  %611 = vmatmul.mubr.bf16.vlgmr.msra.gmra.mrb[4].mxu1 %v337_v41 }
 0x127   :  { %846 = vmatpush1.bf16.msra.mxu0 %v3084_v2  ;;  %887 = vmatpush1.bf16.msra.mxu1 %v3112_v7 }
 0x128   :  { %847 = vmatprep.subr.bf16.mxu0 %v3090_v3  ;;  %888 = vmatprep.subr.bf16.mxu1 %v3131_v10 }
 0x129   :  { %877 = vmatprep.mubr.bf16.mxu0 %v3038_v1  ;;  %918 = vmatprep.mubr.bf16.mxu1 %v3038_v1 }
 0x12b   :  { %848 = vmatpush1.bf16.msra.mxu0 %v3096_v4  ;;  %889 = vmatpush1.bf16.msra.mxu1 %v3136_v11 }
 0x12c   :  { %849 = vmatprep.subr.bf16.mxu0 %v3102_v5  ;;  %890 = vmatprep.subr.bf16.mxu1 %v3153_v14 }
 0x12f   :  { %850 = vmatpush1.bf16.msra.mxu0 %v3118_v8  ;;  %891 = vmatpush1.bf16.msra.mxu1 %v3160_v15 }
 0x130   :  { %851 = vmatprep.subr.bf16.mxu0 %v3125_v9  ;;  %892 = vmatprep.subr.bf16.mxu1 %v3166_v16 }
 0x133   :  { %852 = vmatpush1.bf16.msra.mxu0 %v3143_v12  ;;  %893 = vmatpush1.bf16.msra.mxu1 %v3184_v19 }
 0x134   :  { %853 = vmatprep.subr.bf16.mxu0 %v3148_v13  ;;  %894 = vmatprep.subr.bf16.mxu1 %v3190_v20 }
 0x137   :  { %854 = vmatpush1.bf16.msra.mxu0 %v3172_v17  ;;  %895 = vmatpush1.bf16.msra.mxu1 %v3208_v23 }
 0x138   :  { %855 = vmatprep.subr.bf16.mxu0 %v3178_v18  ;;  %896 = vmatprep.subr.bf16.mxu1 %v3219_v25 }
 0x13b   :  { %856 = vmatpush1.bf16.msra.mxu0 %v3195_v21  ;;  %897 = vmatpush1.bf16.msra.mxu1 %v3229_v27 }
 0x13c   :  { %857 = vmatprep.subr.bf16.mxu0 %v3201_v22  ;;  %898 = vmatprep.subr.bf16.mxu1 %v3235_v28 }
 0x13f   :  { %858 = vmatpush1.bf16.msra.mxu0 %v3213_v24  ;;  %899 = vmatpush1.bf16.msra.mxu1 %v3251_v31 }
 0x140   :  { %859 = vmatprep.subr.bf16.mxu0 %v3224_v26  ;;  %900 = vmatprep.subr.bf16.mxu1 %v3257_v32 }
 0x143   :  { %860 = vmatpush1.bf16.msra.mxu0 %v3242_v29  ;;  %901 = vmatpush1.bf16.msra.mxu1 %v3267_v34 }
 0x144   :  { %1153 = vmatprep.subr.bf16.mxu0 %v3077_v0  ;;  %1194 = vmatprep.subr.bf16.mxu1 %v3107_v6 }
 0x1f9   :  { %v571_v45 = vpop.f32.mrb[4].mxu0  ;;  %v612_v46 = vpop.f32.mrb[4].mxu1 }
 0x1fa   :  { %v572_v47 = vadd.f32 %v571_v45, %v373_v43  ;;  %v573_v49 = vpop.f32.mrb[5].mxu0  ;;  %v614_v50 = vpop.f32.mrb[5].mxu1  ;;  %v613_v60 = vadd.f32 %v612_v46, %v375_v58  ;;  %v3458_v58 = vld [vmem:[%s3774_s3 + $0x28] ss:$16 sps:$4 sm:$0xff]  }
 0x1fb   :  { %v574_v51 = vadd.f32 %v573_v49, %v374_v44  ;;  %v575_v52 = vpop.f32.mrb[6].mxu0  ;;  %v616_v0 = vpop.f32.mrb[6].mxu1  ;;  %v615_v57 = vadd.f32 %v614_v50, %v376_v56  ;;  %v3448_v56 = vld [vmem:[%s3774_s3 + $0x2c] ss:$16 sps:$4 sm:$0xff]  }
 0x1fc   :  { %v2581_v53 = vmul.f32 -1.442695, %v572_v47  ;;  %v576_v6 = vpop.f32.mrb[7].mxu0  ;;  %v617_v54 = vpop.f32.mrb[7].mxu1  ;;  %v3419_v0 = vld [vmem:[%s3774_s3 + $0x4] ss:$16 sps:$4 sm:$0xff]  }
 0x1fd   :  { %v2582_v55 = vmul.f32 -1.442695, %v574_v51  ;;  %v2583_v59 = vmul.f32 -1.442695, %v615_v57  ;;  %v3429_v6 = vld [vmem:[%s3774_s3] ss:$16 sps:$4 sm:$0xff]  }
 0x1fe   :  { %2926 = vpow2.f32 %v2581_v53  ;;  %v3424_v53 = vld [vmem:[%s3774_s3 + $0xc] ss:$16 sps:$4 sm:$0xff]   ;;  %v3434_v54 = vld [vmem:[%s3774_s3 + $0x8] ss:$16 sps:$4 sm:$0xff]   ;;  %v3453_v57 = vld [vmem:[%s3774_s3 + $0x20] ss:$16 sps:$4 sm:$0xff]  }
 0x1ff   :  { %2928 = vpow2.f32 %v2582_v55  ;;  %v3443_v55 = vld [vmem:[%s3774_s3 + $0x24] ss:$16 sps:$4 sm:$0xff]  }
 0x200   :  { %2930 = vpow2.f32 %v2583_v59  ;;  %v3467_v59 = vld [vmem:[%s3774_s3 + $0x44] ss:$16 sps:$4 sm:$0xff]  }
 0x201   :  { %2932 = vtanh.f32 %v613_v60  ;;  %v3472_v60 = vld [vmem:[%s3774_s3 + $0x4c] ss:$16 sps:$4 sm:$0xff]  }
 0x208   :  { %v2927_v61 = vpop.eup %2926 }
 0x209   :  { %v2929_v62 = vpop.eup %2928  ;;  %v622_v63 = vadd.f32 1.0, %v2927_v61  ;;  %v3477_v61 = vld [vmem:[%s3774_s3 + $0x40] ss:$16 sps:$4 sm:$0xff]  }
 0x20a   :  { %v628_v30 = vadd.f32 1.0, %v2929_v62  ;;  %v2931_v33 = vpop.eup %2930  ;;  %v3482_v62 = vld [vmem:[%s3774_s3 + $0x48] ss:$16 sps:$4 sm:$0xff]  }
 0x20b   :  { %2934 = vrcp.f32 %v622_v63  ;;  %v2933_v35 = vpop.eup %2932  ;;  %v635_v40 = vadd.f32 1.0, %v2931_v33  ;;  %v3491_v63 = vld [vmem:[%s3774_s3 + $0x64] ss:$16 sps:$4 sm:$0xff]   ;;  %v3501_v33 = vld [vmem:[%s3774_s3 + $0x60] ss:$16 sps:$4 sm:$0xff]  }
 0x20c   :  { %2936 = vrcp.f32 %v628_v30  ;;  %v3496_v30 = vld [vmem:[%s3774_s3 + $0x6c] ss:$16 sps:$4 sm:$0xff]  }
 0x20d   :  { %2938 = vrcp.f32 %v635_v40  ;;  %v3530_v40 = vld [vmem:[%s3774_s3 + $0x88] ss:$16 sps:$4 sm:$0xff]  }
 0x215   :  { %v2935_v36 = vpop.eup %2934 }
 0x216   :  { %v2937_v38 = vpop.eup %2936  ;;  %v639_v39 = vmul.f32 %v2935_v36, %v2933_v35  ;;  %v3506_v35 = vld [vmem:[%s3774_s3 + $0x68] ss:$16 sps:$4 sm:$0xff]   ;;  %v3515_v36 = vld [vmem:[%s3774_s3 + $0x84] ss:$16 sps:$4 sm:$0xff]  }
 0x217   :  { %v638_v41 = vmul.f32 %v2937_v38, %v3316_v37  ;;  %v2939_v43 = vpop.eup %2938  ;;  %v3520_v38 = vld [vmem:[%s3774_s3 + $0x8c] ss:$16 sps:$4 sm:$0xff]  }
 0x219   :  { %v3363_v42 = vadd.f32 %v639_v39, %v638_v41  ;;  %v3525_v39 = vld [vmem:[%s3774_s3 + $0x80] ss:$16 sps:$4 sm:$0xff]   ;;  %v3537_v41 = vld [vmem:[%s3774_s3 + $0xa4] ss:$16 sps:$4 sm:$0xff]  }
 0x21b   :  { %2940 = vtanh.f32 %v3363_v42 }
 0x225   :  { %v2941_v44 = vpop.eup %2940 }
 0x226   :  { %v642_v45 = vmul.f32 %v2941_v44, %v2939_v43  ;;  %v3549_v43 = vld [vmem:[%s3774_s3 + $0xa8] ss:$16 sps:$4 sm:$0xff]   ;;  %v3554_v44 = vld [vmem:[%s3774_s3 + $0xac] ss:$16 sps:$4 sm:$0xff]  }
 0x228   :  { %2584 = vst [vmem:[%s3778_s4 + $0x8] sm:$0xff] %v642_v45  ;;  %v645_v46 = vpack.c.bf16 %v642_v45, %v642_v45  ;;  %v3560_v45 = vld [vmem:[%s3774_s3 + $0xc4] ss:$16 sps:$4 sm:$0xff]  }
 0x22a   :  { %878 = vmatmul.mubr.bf16.vlgmr.msra.gmra.mrb[8].mxu0 %v645_v46  ;;  %919 = vmatmul.mubr.bf16.vlgmr.msra.gmra.mrb[8].mxu1 %v645_v46  ;;  %v3565_v46 = vld [vmem:[%s3774_s3 + $0xcc] ss:$16 sps:$4 sm:$0xff]  }
 0x22b   :  { %1154 = vmatpush1.bf16.msra.mxu0 %v3084_v2  ;;  %1195 = vmatpush1.bf16.msra.mxu1 %v3112_v7  ;;  %v2585_v2 = vld [vmem:[%s3776_s0 + $0x20] sm:$0xff] }
 0x22c   :  { %1155 = vmatprep.subr.bf16.mxu0 %v3090_v3  ;;  %1196 = vmatprep.subr.bf16.mxu1 %v3131_v10  ;;  %v681_v3 = vunpack.c.l.bf16 %v2585_v2 }
 0x22d   :  { %1185 = vmatprep.mubr.bf16.mxu0 %v3038_v1  ;;  %1226 = vmatprep.mubr.bf16.mxu1 %v3038_v1 }
 0x22f   :  { %1156 = vmatpush1.bf16.msra.mxu0 %v3096_v4  ;;  %1197 = vmatpush1.bf16.msra.mxu1 %v3136_v11  ;;  %v682_v4 = vunpack.c.h.bf16 %v2585_v2  ;;  %v3573_v2 = vld [vmem:[%s3774_s3 + $0xc0] ss:$16 sps:$4 sm:$0xff]  }
 0x230   :  { %1157 = vmatprep.subr.bf16.mxu0 %v3102_v5  ;;  %1198 = vmatprep.subr.bf16.mxu1 %v3153_v14 }
 0x233   :  { %1158 = vmatpush1.bf16.msra.mxu0 %v3118_v8  ;;  %1199 = vmatpush1.bf16.msra.mxu1 %v3160_v15 }
 0x234   :  { %1159 = vmatprep.subr.bf16.mxu0 %v3125_v9  ;;  %1200 = vmatprep.subr.bf16.mxu1 %v3166_v16  ;;  %v2586_v9 = vld [vmem:[%s3776_s0 + $0x28] sm:$0xff] }
 0x237   :  { %1160 = vmatpush1.bf16.msra.mxu0 %v3143_v12  ;;  %1201 = vmatpush1.bf16.msra.mxu1 %v3184_v19  ;;  %v684_v19 = vunpack.c.h.bf16 %v2586_v9 }
 0x238   :  { %1161 = vmatprep.subr.bf16.mxu0 %v3148_v13  ;;  %1202 = vmatprep.subr.bf16.mxu1 %v3190_v20 }
 0x23b   :  { %1162 = vmatpush1.bf16.msra.mxu0 %v3172_v17  ;;  %1203 = vmatpush1.bf16.msra.mxu1 %v3208_v23 }
 0x23c   :  { %1163 = vmatprep.subr.bf16.mxu0 %v3178_v18  ;;  %1204 = vmatprep.subr.bf16.mxu1 %v3219_v25 }
 0x23f   :  { %1164 = vmatpush1.bf16.msra.mxu0 %v3195_v21  ;;  %1205 = vmatpush1.bf16.msra.mxu1 %v3229_v27  ;;  %v683_v21 = vunpack.c.l.bf16 %v2586_v9  ;;  %v2623_v9 = vld [vmem:[%s3776_s0 + $0x30] sm:$0xff] }
 0x240   :  { %1165 = vmatprep.subr.bf16.mxu0 %v3201_v22  ;;  %1206 = vmatprep.subr.bf16.mxu1 %v3235_v28 }
 0x243   :  { %1166 = vmatpush1.bf16.msra.mxu0 %v3213_v24  ;;  %1207 = vmatpush1.bf16.msra.mxu1 %v3251_v31 }
 0x244   :  { %1167 = vmatprep.subr.bf16.mxu0 %v3224_v26  ;;  %1208 = vmatprep.subr.bf16.mxu1 %v3257_v32 }
 0x247   :  { %1168 = vmatpush1.bf16.msra.mxu0 %v3242_v29  ;;  %1209 = vmatpush1.bf16.msra.mxu1 %v3267_v34 }
 0x248   :  { %1461 = vmatprep.subr.bf16.mxu0 %v3419_v0  ;;  %1502 = vmatprep.subr.bf16.mxu1 %v3424_v53 }
 0x2fd   :  { %v879_v5 = vpop.f32.mrb[8].mxu0  ;;  %v920_v7 = vpop.f32.mrb[8].mxu1 }
 0x2fe   :  { %v880_v8 = vadd.f32 %v879_v5, %v681_v3  ;;  %v881_v10 = vpop.f32.mrb[9].mxu0  ;;  %v922_v11 = vpop.f32.mrb[9].mxu1  ;;  %v921_v23 = vadd.f32 %v920_v7, %v683_v21  ;;  %v3578_v3 = vld [vmem:[%s3774_s3 + $0xc8] ss:$16 sps:$4 sm:$0xff]   ;;  %v3590_v5 = vld [vmem:[%s3774_s3 + $0xec] ss:$16 sps:$4 sm:$0xff]  }
 0x2ff   :  { %v882_v12 = vadd.f32 %v881_v10, %v682_v4  ;;  %v883_v13 = vpop.f32.mrb[10].mxu0  ;;  %v924_v14 = vpop.f32.mrb[10].mxu1  ;;  %v923_v20 = vadd.f32 %v922_v11, %v684_v19  ;;  %v3585_v4 = vld [vmem:[%s3774_s3 + $0xe4] ss:$16 sps:$4 sm:$0xff]   ;;  %v3597_v7 = vld [vmem:[%s3774_s3 + $0xe0] ss:$16 sps:$4 sm:$0xff]   ;;  %v989_v10 = vunpack.c.l.bf16 %v2623_v9  ;;  %v990_v11 = vunpack.c.h.bf16 %v2623_v9 }
 0x300   :  { %v2619_v15 = vmul.f32 -1.442695, %v880_v8  ;;  %v884_v16 = vpop.f32.mrb[11].mxu0  ;;  %v925_v17 = vpop.f32.mrb[11].mxu1  ;;  %v3602_v8 = vld [vmem:[%s3774_s3 + $0xe8] ss:$16 sps:$4 sm:$0xff]  }
 0x301   :  { %v2620_v18 = vmul.f32 -1.442695, %v882_v12  ;;  %v2621_v22 = vmul.f32 -1.442695, %v923_v20 }
 0x302   :  { %2942 = vpow2.f32 %v2619_v15  ;;  %v2624_v15 = vld [vmem:[%s3776_s0 + $0x38] sm:$0xff] }
 0x303   :  { %2944 = vpow2.f32 %v2620_v18 }
 0x304   :  { %2946 = vpow2.f32 %v2621_v22 }
 0x305   :  { %2948 = vtanh.f32 %v921_v23 }
 0x30c   :  { %v2943_v24 = vpop.eup %2942 }
 0x30d   :  { %v2945_v25 = vpop.eup %2944  ;;  %v930_v26 = vadd.f32 1.0, %v2943_v24 }
 0x30e   :  { %v936_v27 = vadd.f32 1.0, %v2945_v25  ;;  %v2947_v28 = vpop.eup %2946  ;;  %v992_v25 = vunpack.c.h.bf16 %v2624_v15 }
 0x30f   :  { %2950 = vrcp.f32 %v930_v26  ;;  %v2949_v29 = vpop.eup %2948  ;;  %v943_v37 = vadd.f32 1.0, %v2947_v28 }
 0x310   :  { %2952 = vrcp.f32 %v936_v27  ;;  %v991_v27 = vunpack.c.l.bf16 %v2624_v15 }
 0x311   :  { %2954 = vrcp.f32 %v943_v37 }
 0x319   :  { %v2951_v31 = vpop.eup %2950 }
 0x31a   :  { %v2953_v32 = vpop.eup %2952  ;;  %v947_v34 = vmul.f32 %v2951_v31, %v2949_v29 }
 0x31b   :  { %v946_v47 = vmul.f32 %v2953_v32, %v3363_v42  ;;  %v2955_v49 = vpop.eup %2954  ;;  %v3544_v42 = vld [vmem:[%s3774_s3 + $0xa0] ss:$16 sps:$4 sm:$0xff]  }
 0x31d   :  { %v3408_v48 = vadd.f32 %v947_v34, %v946_v47 }
 0x31f   :  { %2956 = vtanh.f32 %v3408_v48 }
 0x329   :  { %v2957_v50 = vpop.eup %2956 }
 0x32a   :  { %v950_v51 = vmul.f32 %v2957_v50, %v2955_v49 }
 0x32c   :  { %2622 = vst [vmem:[%s3778_s4 + $0x10] sm:$0xff] %v950_v51  ;;  %v953_v52 = vpack.c.bf16 %v950_v51, %v950_v51 }
 0x32e   :  { %1186 = vmatmul.mubr.bf16.vlgmr.msra.gmra.mrb[12].mxu0 %v953_v52  ;;  %1227 = vmatmul.mubr.bf16.vlgmr.msra.gmra.mrb[12].mxu1 %v953_v52 }
 0x32f   :  { %1493 = vmatprep.mubr.bf16.mxu0 %v3038_v1  ;;  %1534 = vmatprep.mubr.bf16.mxu1 %v3038_v1 }
 0x330   :  { %1462 = vmatpush1.bf16.msra.mxu0 %v3429_v6  ;;  %1503 = vmatpush1.bf16.msra.mxu1 %v3434_v54 }
 0x331   :  { %1463 = vmatprep.subr.bf16.mxu0 %v3443_v55  ;;  %1504 = vmatprep.subr.bf16.mxu1 %v3448_v56 }
 0x334   :  { %1464 = vmatpush1.bf16.msra.mxu0 %v3453_v57  ;;  %1505 = vmatpush1.bf16.msra.mxu1 %v3458_v58 }
 0x335   :  { %1465 = vmatprep.subr.bf16.mxu0 %v3467_v59  ;;  %1506 = vmatprep.subr.bf16.mxu1 %v3472_v60 }
 0x338   :  { %1466 = vmatpush1.bf16.msra.mxu0 %v3477_v61  ;;  %1507 = vmatpush1.bf16.msra.mxu1 %v3482_v62 }
 0x339   :  { %1467 = vmatprep.subr.bf16.mxu0 %v3491_v63  ;;  %1508 = vmatprep.subr.bf16.mxu1 %v3496_v30 }
 0x33c   :  { %1468 = vmatpush1.bf16.msra.mxu0 %v3501_v33  ;;  %1509 = vmatpush1.bf16.msra.mxu1 %v3506_v35 }
 0x33d   :  { %1469 = vmatprep.subr.bf16.mxu0 %v3515_v36  ;;  %1510 = vmatprep.subr.bf16.mxu1 %v3520_v38 }
 0x340   :  { %1470 = vmatpush1.bf16.msra.mxu0 %v3525_v39  ;;  %1511 = vmatpush1.bf16.msra.mxu1 %v3530_v40 }
 0x341   :  { %1471 = vmatprep.subr.bf16.mxu0 %v3537_v41  ;;  %1512 = vmatprep.subr.bf16.mxu1 %v3554_v44 }
 0x344   :  { %1472 = vmatpush1.bf16.msra.mxu0 %v3544_v42  ;;  %1513 = vmatpush1.bf16.msra.mxu1 %v3549_v43 }
 0x345   :  { %1473 = vmatprep.subr.bf16.mxu0 %v3560_v45  ;;  %1514 = vmatprep.subr.bf16.mxu1 %v3565_v46 }
 0x348   :  { %1474 = vmatpush1.bf16.msra.mxu0 %v3573_v2  ;;  %1515 = vmatpush1.bf16.msra.mxu1 %v3578_v3 }
 0x349   :  { %1475 = vmatprep.subr.bf16.mxu0 %v3585_v4  ;;  %1516 = vmatprep.subr.bf16.mxu1 %v3590_v5 }
 0x34c   :  { %1476 = vmatpush1.bf16.msra.mxu0 %v3597_v7  ;;  %1517 = vmatpush1.bf16.msra.mxu1 %v3602_v8 }
 0x34d   :  { %1769 = vmatprep.subr.bf16.mxu0 %v3419_v0  ;;  %1810 = vmatprep.subr.bf16.mxu1 %v3424_v53 }
 0x401   :  { %v1187_v12 = vpop.f32.mrb[12].mxu0  ;;  %v1228_v13 = vpop.f32.mrb[12].mxu1 }
 0x402   :  { %v1188_v14 = vadd.f32 %v1187_v12, %v989_v10  ;;  %v1189_v16 = vpop.f32.mrb[13].mxu0  ;;  %v1230_v17 = vpop.f32.mrb[13].mxu1  ;;  %v1229_v29 = vadd.f32 %v1228_v13, %v991_v27 }
 0x403   :  { %v1190_v18 = vadd.f32 %v1189_v16, %v990_v11  ;;  %v1191_v19 = vpop.f32.mrb[14].mxu0  ;;  %v1232_v20 = vpop.f32.mrb[14].mxu1  ;;  %v1231_v26 = vadd.f32 %v1230_v17, %v992_v25 }
 0x404   :  { %v2657_v21 = vmul.f32 -1.442695, %v1188_v14  ;;  %v1192_v22 = vpop.f32.mrb[15].mxu0  ;;  %v1233_v23 = vpop.f32.mrb[15].mxu1 }
 0x405   :  { %v2658_v24 = vmul.f32 -1.442695, %v1190_v18  ;;  %v2659_v28 = vmul.f32 -1.442695, %v1231_v26 }
 0x406   :  { %2958 = vpow2.f32 %v2657_v21  ;;  %v2662_v21 = vld [vmem:[%s3776_s0 + $0x48] sm:$0xff] }
 0x407   :  { %2960 = vpow2.f32 %v2658_v24 }
 0x408   :  { %2962 = vpow2.f32 %v2659_v28 }
 0x409   :  { %2964 = vtanh.f32 %v1229_v29 }
 0x410   :  { %v2959_v31 = vpop.eup %2958 }
 0x411   :  { %v2961_v32 = vpop.eup %2960  ;;  %v1238_v34 = vadd.f32 1.0, %v2959_v31 }
 0x412   :  { %v1244_v37 = vadd.f32 1.0, %v2961_v32  ;;  %v2963_v47 = vpop.eup %2962  ;;  %v1300_v32 = vunpack.c.h.bf16 %v2662_v21 }
 0x413   :  { %2966 = vrcp.f32 %v1238_v34  ;;  %v2965_v49 = vpop.eup %2964  ;;  %v1251_v9 = vadd.f32 1.0, %v2963_v47 }
 0x414   :  { %2968 = vrcp.f32 %v1244_v37  ;;  %v1299_v37 = vunpack.c.l.bf16 %v2662_v21 }
 0x415   :  { %2970 = vrcp.f32 %v1251_v9 }
 0x41d   :  { %v2967_v50 = vpop.eup %2966 }
 0x41e   :  { %v2969_v51 = vpop.eup %2968  ;;  %v1255_v52 = vmul.f32 %v2967_v50, %v2965_v49 }
 0x41f   :  { %v1254_v10 = vmul.f32 %v2969_v51, %v3408_v48  ;;  %v2971_v12 = vpop.eup %2970  ;;  %v2661_v48 = vld [vmem:[%s3776_s0 + $0x40] sm:$0xff] }
 0x420   :  { %v1297_v16 = vunpack.c.l.bf16 %v2661_v48  ;;  %v1298_v17 = vunpack.c.h.bf16 %v2661_v48 }
 0x421   :  { %v3617_v11 = vadd.f32 %v1255_v52, %v1254_v10 }
 0x423   :  { %2972 = vtanh.f32 %v3617_v11 }
 0x42d   :  { %v2973_v13 = vpop.eup %2972 }
 0x42e   :  { %v1258_v14 = vmul.f32 %v2973_v13, %v2971_v12 }
 0x430   :  { %2660 = vst [vmem:[%s3778_s4 + $0x18] sm:$0xff] %v1258_v14  ;;  %v1261_v15 = vpack.c.bf16 %v1258_v14, %v1258_v14 }
 0x432   :  { %1494 = vmatmul.mubr.bf16.vlgmr.msra.gmra.mrb[16].mxu0 %v1261_v15  ;;  %1535 = vmatmul.mubr.bf16.vlgmr.msra.gmra.mrb[16].mxu1 %v1261_v15 }
 0x433   :  { %1770 = vmatpush1.bf16.msra.mxu0 %v3429_v6  ;;  %1811 = vmatpush1.bf16.msra.mxu1 %v3434_v54 }
 0x434   :  { %1771 = vmatprep.subr.bf16.mxu0 %v3443_v55  ;;  %1812 = vmatprep.subr.bf16.mxu1 %v3448_v56 }
 0x435   :  { %1801 = vmatprep.mubr.bf16.mxu0 %v3038_v1  ;;  %1842 = vmatprep.mubr.bf16.mxu1 %v3038_v1 }
 0x437   :  { %1772 = vmatpush1.bf16.msra.mxu0 %v3453_v57  ;;  %1813 = vmatpush1.bf16.msra.mxu1 %v3458_v58 }
 0x438   :  { %1773 = vmatprep.subr.bf16.mxu0 %v3467_v59  ;;  %1814 = vmatprep.subr.bf16.mxu1 %v3472_v60 }
 0x43b   :  { %1774 = vmatpush1.bf16.msra.mxu0 %v3477_v61  ;;  %1815 = vmatpush1.bf16.msra.mxu1 %v3482_v62 }
 0x43c   :  { %1775 = vmatprep.subr.bf16.mxu0 %v3491_v63  ;;  %1816 = vmatprep.subr.bf16.mxu1 %v3496_v30 }
 0x43f   :  { %1776 = vmatpush1.bf16.msra.mxu0 %v3501_v33  ;;  %1817 = vmatpush1.bf16.msra.mxu1 %v3506_v35 }
 0x440   :  { %1777 = vmatprep.subr.bf16.mxu0 %v3515_v36  ;;  %1818 = vmatprep.subr.bf16.mxu1 %v3520_v38 }
 0x443   :  { %1778 = vmatpush1.bf16.msra.mxu0 %v3525_v39  ;;  %1819 = vmatpush1.bf16.msra.mxu1 %v3530_v40 }
 0x444   :  { %1779 = vmatprep.subr.bf16.mxu0 %v3537_v41  ;;  %1820 = vmatprep.subr.bf16.mxu1 %v3554_v44 }
 0x447   :  { %1780 = vmatpush1.bf16.msra.mxu0 %v3544_v42  ;;  %1821 = vmatpush1.bf16.msra.mxu1 %v3549_v43 }
 0x448   :  { %1781 = vmatprep.subr.bf16.mxu0 %v3560_v45  ;;  %1822 = vmatprep.subr.bf16.mxu1 %v3565_v46 }
 0x44b   :  { %1782 = vmatpush1.bf16.msra.mxu0 %v3573_v2  ;;  %1823 = vmatpush1.bf16.msra.mxu1 %v3578_v3 }
 0x44c   :  { %1783 = vmatprep.subr.bf16.mxu0 %v3585_v4  ;;  %1824 = vmatprep.subr.bf16.mxu1 %v3590_v5 }
 0x44f   :  { %1784 = vmatpush1.bf16.msra.mxu0 %v3597_v7  ;;  %1825 = vmatpush1.bf16.msra.mxu1 %v3602_v8 }
 0x450   :  { %2077 = vmatprep.subr.bf16.mxu0 %v3419_v0  ;;  %2118 = vmatprep.subr.bf16.mxu1 %v3424_v53 }
 0x505   :  { %v1495_v18 = vpop.f32.mrb[16].mxu0  ;;  %v1536_v19 = vpop.f32.mrb[16].mxu1 }
 0x506   :  { %v1496_v20 = vadd.f32 %v1495_v18, %v1297_v16  ;;  %v1497_v22 = vpop.f32.mrb[17].mxu0  ;;  %v1538_v23 = vpop.f32.mrb[17].mxu1  ;;  %v1537_v49 = vadd.f32 %v1536_v19, %v1299_v37 }
 0x507   :  { %v1498_v24 = vadd.f32 %v1497_v22, %v1298_v17  ;;  %v1499_v25 = vpop.f32.mrb[18].mxu0  ;;  %v1540_v26 = vpop.f32.mrb[18].mxu1  ;;  %v1539_v34 = vadd.f32 %v1538_v23, %v1300_v32 }
 0x508   :  { %v2695_v27 = vmul.f32 -1.442695, %v1496_v20  ;;  %v1500_v28 = vpop.f32.mrb[19].mxu0  ;;  %v1541_v29 = vpop.f32.mrb[19].mxu1 }
 0x509   :  { %v2696_v31 = vmul.f32 -1.442695, %v1498_v24  ;;  %v2697_v47 = vmul.f32 -1.442695, %v1539_v34 }
 0x50a   :  { %2974 = vpow2.f32 %v2695_v27  ;;  %v2700_v27 = vld [vmem:[%s3776_s0 + $0x58] sm:$0xff] }
 0x50b   :  { %2976 = vpow2.f32 %v2696_v31 }
 0x50c   :  { %2978 = vpow2.f32 %v2697_v47 }
 0x50d   :  { %2980 = vtanh.f32 %v1537_v49  ;;  %v1608_v49 = vunpack.c.h.bf16 %v2700_v27 }
 0x514   :  { %v2975_v50 = vpop.eup %2974 }
 0x515   :  { %v2977_v51 = vpop.eup %2976  ;;  %v1546_v52 = vadd.f32 1.0, %v2975_v50 }
 0x516   :  { %v1552_v9 = vadd.f32 1.0, %v2977_v51  ;;  %v2979_v10 = vpop.eup %2978  ;;  %v1607_v51 = vunpack.c.l.bf16 %v2700_v27 }
 0x517   :  { %2982 = vrcp.f32 %v1546_v52  ;;  %v2981_v12 = vpop.eup %2980  ;;  %v1559_v48 = vadd.f32 1.0, %v2979_v10 }
 0x518   :  { %2984 = vrcp.f32 %v1552_v9 }
 0x519   :  { %2986 = vrcp.f32 %v1559_v48 }
 0x521   :  { %v2983_v13 = vpop.eup %2982 }
 0x522   :  { %v2985_v14 = vpop.eup %2984  ;;  %v1563_v15 = vmul.f32 %v2983_v13, %v2981_v12 }
 0x523   :  { %v1562_v16 = vmul.f32 %v2985_v14, %v3617_v11  ;;  %v2987_v18 = vpop.eup %2986  ;;  %v2699_v11 = vld [vmem:[%s3776_s0 + $0x50] sm:$0xff] }
 0x524   :  { %v1605_v22 = vunpack.c.l.bf16 %v2699_v11  ;;  %v1606_v23 = vunpack.c.h.bf16 %v2699_v11 }
 0x525   :  { %v3664_v17 = vadd.f32 %v1563_v15, %v1562_v16 }
 0x527   :  { %2988 = vtanh.f32 %v3664_v17 }
 0x531   :  { %v2989_v19 = vpop.eup %2988 }
 0x532   :  { %v1566_v20 = vmul.f32 %v2989_v19, %v2987_v18 }
 0x534   :  { %2698 = vst [vmem:[%s3778_s4 + $0x20] sm:$0xff] %v1566_v20  ;;  %v1569_v21 = vpack.c.bf16 %v1566_v20, %v1566_v20 }
 0x536   :  { %1802 = vmatmul.mubr.bf16.vlgmr.msra.gmra.mrb[20].mxu0 %v1569_v21  ;;  %1843 = vmatmul.mubr.bf16.vlgmr.msra.gmra.mrb[20].mxu1 %v1569_v21 }
 0x537   :  { %2078 = vmatpush1.bf16.msra.mxu0 %v3429_v6  ;;  %2119 = vmatpush1.bf16.msra.mxu1 %v3434_v54 }
 0x538   :  { %2079 = vmatprep.subr.bf16.mxu0 %v3443_v55  ;;  %2120 = vmatprep.subr.bf16.mxu1 %v3448_v56 }
 0x539   :  { %2109 = vmatprep.mubr.bf16.mxu0 %v3038_v1  ;;  %2150 = vmatprep.mubr.bf16.mxu1 %v3038_v1 }
 0x53b   :  { %2080 = vmatpush1.bf16.msra.mxu0 %v3453_v57  ;;  %2121 = vmatpush1.bf16.msra.mxu1 %v3458_v58 }
 0x53c   :  { %2081 = vmatprep.subr.bf16.mxu0 %v3467_v59  ;;  %2122 = vmatprep.subr.bf16.mxu1 %v3472_v60 }
 0x53f   :  { %2082 = vmatpush1.bf16.msra.mxu0 %v3477_v61  ;;  %2123 = vmatpush1.bf16.msra.mxu1 %v3482_v62 }
 0x540   :  { %2083 = vmatprep.subr.bf16.mxu0 %v3491_v63  ;;  %2124 = vmatprep.subr.bf16.mxu1 %v3496_v30 }
 0x543   :  { %2084 = vmatpush1.bf16.msra.mxu0 %v3501_v33  ;;  %2125 = vmatpush1.bf16.msra.mxu1 %v3506_v35 }
 0x544   :  { %2085 = vmatprep.subr.bf16.mxu0 %v3515_v36  ;;  %2126 = vmatprep.subr.bf16.mxu1 %v3520_v38 }
 0x547   :  { %2086 = vmatpush1.bf16.msra.mxu0 %v3525_v39  ;;  %2127 = vmatpush1.bf16.msra.mxu1 %v3530_v40 }
 0x548   :  { %2087 = vmatprep.subr.bf16.mxu0 %v3537_v41  ;;  %2128 = vmatprep.subr.bf16.mxu1 %v3554_v44 }
 0x54b   :  { %2088 = vmatpush1.bf16.msra.mxu0 %v3544_v42  ;;  %2129 = vmatpush1.bf16.msra.mxu1 %v3549_v43 }
 0x54c   :  { %2089 = vmatprep.subr.bf16.mxu0 %v3560_v45  ;;  %2130 = vmatprep.subr.bf16.mxu1 %v3565_v46 }
 0x54f   :  { %2090 = vmatpush1.bf16.msra.mxu0 %v3573_v2  ;;  %2131 = vmatpush1.bf16.msra.mxu1 %v3578_v3 }
 0x550   :  { %2091 = vmatprep.subr.bf16.mxu0 %v3585_v4  ;;  %2132 = vmatprep.subr.bf16.mxu1 %v3590_v5 }
 0x553   :  { %2092 = vmatpush1.bf16.msra.mxu0 %v3597_v7  ;;  %2133 = vmatpush1.bf16.msra.mxu1 %v3602_v8 }
 0x554   :  { %2385 = vmatprep.subr.bf16.mxu0 %v3419_v0  ;;  %2426 = vmatprep.subr.bf16.mxu1 %v3424_v53 }
 0x609   :  { %v1803_v24 = vpop.f32.mrb[20].mxu0  ;;  %v1844_v25 = vpop.f32.mrb[20].mxu1 }
 0x60a   :  { %v1804_v26 = vadd.f32 %v1803_v24, %v1605_v22  ;;  %v1805_v28 = vpop.f32.mrb[21].mxu0  ;;  %v1846_v29 = vpop.f32.mrb[21].mxu1  ;;  %v1845_v9 = vadd.f32 %v1844_v25, %v1607_v51 }
 0x60b   :  { %v1806_v31 = vadd.f32 %v1805_v28, %v1606_v23  ;;  %v1807_v32 = vpop.f32.mrb[22].mxu0  ;;  %v1848_v0 = vpop.f32.mrb[22].mxu1  ;;  %v1847_v50 = vadd.f32 %v1846_v29, %v1608_v49  ;;  %v2776_v49 = vld [vmem:[%s3776_s0 + $0x78] sm:$0xff] }
 0x60c   :  { %v2733_v34 = vmul.f32 -1.442695, %v1804_v26  ;;  %v1808_v53 = vpop.f32.mrb[23].mxu0  ;;  %v1849_v37 = vpop.f32.mrb[23].mxu1  ;;  %v2775_v32 = vld [vmem:[%s3776_s0 + $0x70] sm:$0xff] }
 0x60d   :  { %v2734_v47 = vmul.f32 -1.442695, %v1806_v31  ;;  %v2735_v52 = vmul.f32 -1.442695, %v1847_v50  ;;  %v2221_v0 = vunpack.c.l.bf16 %v2775_v32 }
 0x60e   :  { %2990 = vpow2.f32 %v2733_v34  ;;  %v2222_v34 = vunpack.c.h.bf16 %v2775_v32 }
 0x60f   :  { %2992 = vpow2.f32 %v2734_v47 }
 0x610   :  { %2994 = vpow2.f32 %v2735_v52 }
 0x611   :  { %2996 = vtanh.f32 %v1845_v9 }
 0x618   :  { %v2991_v10 = vpop.eup %2990 }
 0x619   :  { %v2993_v12 = vpop.eup %2992  ;;  %v1854_v13 = vadd.f32 1.0, %v2991_v10 }
 0x61a   :  { %v1860_v14 = vadd.f32 1.0, %v2993_v12  ;;  %v2995_v15 = vpop.eup %2994 }
 0x61b   :  { %2998 = vrcp.f32 %v1854_v13  ;;  %v2997_v48 = vpop.eup %2996  ;;  %v1867_v20 = vadd.f32 1.0, %v2995_v15 }
 0x61c   :  { %3000 = vrcp.f32 %v1860_v14 }
 0x61d   :  { %3002 = vrcp.f32 %v1867_v20 }
 0x625   :  { %v2999_v16 = vpop.eup %2998 }
 0x626   :  { %v3001_v18 = vpop.eup %3000  ;;  %v1871_v19 = vmul.f32 %v2999_v16, %v2997_v48  ;;  %v2224_v48 = vunpack.c.h.bf16 %v2776_v49 }
 0x627   :  { %v1870_v21 = vmul.f32 %v3001_v18, %v3664_v17  ;;  %v3003_v22 = vpop.eup %3002  ;;  %v2223_v18 = vunpack.c.l.bf16 %v2776_v49 }
 0x629   :  { %v3711_v11 = vadd.f32 %v1871_v19, %v1870_v21 }
 0x62b   :  { %3004 = vtanh.f32 %v3711_v11 }
 0x635   :  { %v3005_v23 = vpop.eup %3004 }
 0x636   :  { %v1874_v24 = vmul.f32 %v3005_v23, %v3003_v22 }
 0x638   :  { %2736 = vst [vmem:[%s3778_s4 + $0x28] sm:$0xff] %v1874_v24  ;;  %v1877_v25 = vpack.c.bf16 %v1874_v24, %v1874_v24 }
 0x63a   :  { %2110 = vmatmul.mubr.bf16.vlgmr.msra.gmra.mrb[24].mxu0 %v1877_v25  ;;  %2151 = vmatmul.mubr.bf16.vlgmr.msra.gmra.mrb[24].mxu1 %v1877_v25 }
 0x63b   :  { %2386 = vmatpush1.bf16.msra.mxu0 %v3429_v6  ;;  %2427 = vmatpush1.bf16.msra.mxu1 %v3434_v54 }
 0x63c   :  { %2387 = vmatprep.subr.bf16.mxu0 %v3443_v55  ;;  %2428 = vmatprep.subr.bf16.mxu1 %v3448_v56 }
 0x63d   :  { %2417 = vmatprep.mubr.bf16.mxu0 %v3038_v1  ;;  %2458 = vmatprep.mubr.bf16.mxu1 %v3038_v1  ;;  %v2737_v1 = vld [vmem:[%s3776_s0 + $0x60] sm:$0xff] }
 0x63e   :  { %v1913_v6 = vunpack.c.l.bf16 %v2737_v1  ;;  %v1914_v54 = vunpack.c.h.bf16 %v2737_v1 }
 0x63f   :  { %2388 = vmatpush1.bf16.msra.mxu0 %v3453_v57  ;;  %2429 = vmatpush1.bf16.msra.mxu1 %v3458_v58  ;;  %v2738_v58 = vld [vmem:[%s3776_s0 + $0x68] sm:$0xff] }
 0x640   :  { %2389 = vmatprep.subr.bf16.mxu0 %v3467_v59  ;;  %2430 = vmatprep.subr.bf16.mxu1 %v3472_v60 }
 0x643   :  { %2390 = vmatpush1.bf16.msra.mxu0 %v3477_v61  ;;  %2431 = vmatpush1.bf16.msra.mxu1 %v3482_v62 }
 0x644   :  { %2391 = vmatprep.subr.bf16.mxu0 %v3491_v63  ;;  %2432 = vmatprep.subr.bf16.mxu1 %v3496_v30 }
 0x647   :  { %2392 = vmatpush1.bf16.msra.mxu0 %v3501_v33  ;;  %2433 = vmatpush1.bf16.msra.mxu1 %v3506_v35 }
 0x648   :  { %2393 = vmatprep.subr.bf16.mxu0 %v3515_v36  ;;  %2434 = vmatprep.subr.bf16.mxu1 %v3520_v38  ;;  %v1916_v38 = vunpack.c.h.bf16 %v2738_v58 }
 0x64b   :  { %2394 = vmatpush1.bf16.msra.mxu0 %v3525_v39  ;;  %2435 = vmatpush1.bf16.msra.mxu1 %v3530_v40  ;;  %v1915_v40 = vunpack.c.l.bf16 %v2738_v58 }
 0x64c   :  { %2395 = vmatprep.subr.bf16.mxu0 %v3537_v41  ;;  %2436 = vmatprep.subr.bf16.mxu1 %v3554_v44 }
 0x64f   :  { %2396 = vmatpush1.bf16.msra.mxu0 %v3544_v42  ;;  %2437 = vmatpush1.bf16.msra.mxu1 %v3549_v43 }
 0x650   :  { %2397 = vmatprep.subr.bf16.mxu0 %v3560_v45  ;;  %2438 = vmatprep.subr.bf16.mxu1 %v3565_v46 }
 0x653   :  { %2398 = vmatpush1.bf16.msra.mxu0 %v3573_v2  ;;  %2439 = vmatpush1.bf16.msra.mxu1 %v3578_v3 }
 0x654   :  { %2399 = vmatprep.subr.bf16.mxu0 %v3585_v4  ;;  %2440 = vmatprep.subr.bf16.mxu1 %v3590_v5 }
 0x657   :  { %2400 = vmatpush1.bf16.msra.mxu0 %v3597_v7  ;;  %2441 = vmatpush1.bf16.msra.mxu1 %v3602_v8 }
 0x70d   :  { %v2111_v55 = vpop.f32.mrb[24].mxu0  ;;  %v2152_v56 = vpop.f32.mrb[24].mxu1 }
 0x70e   :  { %v2112_v57 = vadd.f32 %v2111_v55, %v1913_v6  ;;  %v2113_v59 = vpop.f32.mrb[25].mxu0  ;;  %v2154_v60 = vpop.f32.mrb[25].mxu1  ;;  %v2153_v42 = vadd.f32 %v2152_v56, %v1915_v40 }
 0x70f   :  { %v2114_v61 = vadd.f32 %v2113_v59, %v1914_v54  ;;  %v2115_v62 = vpop.f32.mrb[26].mxu0  ;;  %v2156_v63 = vpop.f32.mrb[26].mxu1  ;;  %v2155_v39 = vadd.f32 %v2154_v60, %v1916_v38 }
 0x710   :  { %v2771_v30 = vmul.f32 -1.442695, %v2112_v57  ;;  %v2116_v33 = vpop.f32.mrb[27].mxu0  ;;  %v2157_v35 = vpop.f32.mrb[27].mxu1 }
 0x711   :  { %v2772_v36 = vmul.f32 -1.442695, %v2114_v61  ;;  %v2773_v41 = vmul.f32 -1.442695, %v2155_v39 }
 0x712   :  { %3006 = vpow2.f32 %v2771_v30 }
 0x713   :  { %3008 = vpow2.f32 %v2772_v36 }
 0x714   :  { %3010 = vpow2.f32 %v2773_v41 }
 0x715   :  { %3012 = vtanh.f32 %v2153_v42 }
 0x71c   :  { %v3007_v43 = vpop.eup %3006 }
 0x71d   :  { %v3009_v44 = vpop.eup %3008  ;;  %v2162_v45 = vadd.f32 1.0, %v3007_v43 }
 0x71e   :  { %v2168_v46 = vadd.f32 1.0, %v3009_v44  ;;  %v3011_v2 = vpop.eup %3010 }
 0x71f   :  { %3014 = vrcp.f32 %v2162_v45  ;;  %v3013_v3 = vpop.eup %3012  ;;  %v2175_v8 = vadd.f32 1.0, %v3011_v2 }
 0x720   :  { %3016 = vrcp.f32 %v2168_v46 }
 0x721   :  { %3018 = vrcp.f32 %v2175_v8 }
 0x729   :  { %v3015_v4 = vpop.eup %3014 }
 0x72a   :  { %v3017_v5 = vpop.eup %3016  ;;  %v2179_v7 = vmul.f32 %v3015_v4, %v3013_v3 }
 0x72b   :  { %v2178_v17 = vmul.f32 %v3017_v5, %v3711_v11  ;;  %v3019_v27 = vpop.eup %3018 }
 0x72d   :  { %v2180_v26 = vadd.f32 %v2179_v7, %v2178_v17 }
 0x72f   :  { %3020 = vtanh.f32 %v2180_v26 }
 0x739   :  { %v3021_v28 = vpop.eup %3020 }
 0x73a   :  { %v2182_v29 = vmul.f32 %v3021_v28, %v3019_v27 }
 0x73c   :  { %2774 = vst [vmem:[%s3778_s4 + $0x30] sm:$0xff] %v2182_v29  ;;  %v2185_v31 = vpack.c.bf16 %v2182_v29, %v2182_v29 }
 0x73e   :  { %2418 = vmatmul.mubr.bf16.vlgmr.msra.gmra.mrb[28].mxu0 %v2185_v31  ;;  %2459 = vmatmul.mubr.bf16.vlgmr.msra.gmra.mrb[28].mxu1 %v2185_v31 }
 0x811   :  { %v2419_v53 = vpop.f32.mrb[28].mxu0  ;;  %v2460_v37 = vpop.f32.mrb[28].mxu1 }
 0x812   :  { %v2420_v47 = vadd.f32 %v2419_v53, %v2221_v0  ;;  %v2421_v50 = vpop.f32.mrb[29].mxu0  ;;  %v2462_v51 = vpop.f32.mrb[29].mxu1  ;;  %v2461_v20 = vadd.f32 %v2460_v37, %v2223_v18 }
 0x813   :  { %v2422_v52 = vadd.f32 %v2421_v50, %v2222_v34  ;;  %v2423_v9 = vpop.f32.mrb[30].mxu0  ;;  %v2464_v10 = vpop.f32.mrb[30].mxu1  ;;  %v2463_v16 = vadd.f32 %v2462_v51, %v2224_v48 }
 0x814   :  { %v2809_v12 = vmul.f32 -1.442695, %v2420_v47  ;;  %v2424_v13 = vpop.f32.mrb[31].mxu0  ;;  %v2465_v14 = vpop.f32.mrb[31].mxu1 }
 0x815   :  { %v2810_v15 = vmul.f32 -1.442695, %v2422_v52  ;;  %v2811_v19 = vmul.f32 -1.442695, %v2463_v16 }
 0x816   :  { %3022 = vpow2.f32 %v2809_v12 }
 0x817   :  { %3024 = vpow2.f32 %v2810_v15 }
 0x818   :  { %3026 = vpow2.f32 %v2811_v19 }
 0x819   :  { %3028 = vtanh.f32 %v2461_v20 }
 0x820   :  { %v3023_v21 = vpop.eup %3022 }
 0x821   :  { %v3025_v11 = vpop.eup %3024  ;;  %v2470_v22 = vadd.f32 1.0, %v3023_v21 }
 0x822   :  { %v2476_v23 = vadd.f32 1.0, %v3025_v11  ;;  %v3027_v24 = vpop.eup %3026 }
 0x823   :  { %3030 = vrcp.f32 %v2470_v22  ;;  %v3029_v25 = vpop.eup %3028  ;;  %v2483_v55 = vadd.f32 1.0, %v3027_v24 }
 0x824   :  { %3032 = vrcp.f32 %v2476_v23 }
 0x825   :  { %3034 = vrcp.f32 %v2483_v55 }
 0x82d   :  { %v3031_v1 = vpop.eup %3030 }
 0x82e   :  { %v3033_v6 = vpop.eup %3032  ;;  %v2487_v54 = vmul.f32 %v3031_v1, %v3029_v25 }
 0x82f   :  { %v2486_v56 = vmul.f32 %v3033_v6, %v2180_v26  ;;  %v3035_v58 = vpop.eup %3034 }
 0x831   :  { %v2488_v57 = vadd.f32 %v2487_v54, %v2486_v56 }
 0x833   :  { %3036 = vtanh.f32 %v2488_v57  ;;  %2499 = vst [vmem:[%s3779_s6] sm:$0xff] %v2488_v57 }
 0x83d   :  { %v3037_v59 = vpop.eup %3036 }
 0x83e   :  { %v2490_v60 = vmul.f32 %v3037_v59, %v3035_v58 }
 0x840   :  { %2812 = vst [vmem:[%s3778_s4 + $0x38] sm:$0xff] %v2490_v60  ;;  %2498 = vst [vmem:[%s3780_s5] sm:$0xff] %v2490_v60 }

</bundles_post_ra>
